<compile_context>
chip_gen: v7x
topology: tpu7x:2x2x1
jax: 0.10.0
libtpu: 0.0.40
codegen_flags: <defaults>
</compile_context>

<pallas_src>
import functools

import jax
import jax.numpy as jnp
from jax import lax
from jax.experimental import pallas as pl
from jax.experimental.pallas import tpu as pltpu


def _round_up(x: int, m: int) -> int:
    return pl.cdiv(x, m) * m


def gnn_layer_kernel(a_ref, x_ref, w_ref, b_ref, o_ref, acc_ref, *, tile_src):
    # a_ref:   (TK, TJ)            int8  A tile in natural (src, dst) layout
    # x_ref:   (n_src_pad, Cin)    bf16  resident, degree-pre-scaled source features
    # w_ref:   (Cin, Cout_pad)     f32   linear weight (pre-transposed: feat @ W)
    # b_ref:   (1,  Cout_pad)      f32   linear bias (zero-padded)
    # o_ref:   (TJ, Cout_pad)      f32   output tile (resident across the src axis)
    # acc_ref: (TJ, Cin)           f32   VMEM accumulator
    k = pl.program_id(1)

    @pl.when(k == 0)
    def _():
        acc_ref[...] = jnp.zeros_like(acc_ref)

    # int8 -> bf16 upcast of the adjacency tile (exact for 0/1; VPU filler under DMA),
    # then an MXU matmul that contracts the src dim of both operands, i.e. A_tile^T @ x
    # without any materialized transpose (the (dst, src) view lives in the index_map).
    a_blk = a_ref[...].astype(jnp.bfloat16)                       # (TK, TJ)
    start = pl.multiple_of(k * tile_src, tile_src)
    feat = x_ref[pl.ds(start, tile_src), :]                       # (TK, Cin) bf16
    acc_ref[...] += lax.dot_general(
        a_blk, feat,
        dimension_numbers=(((0,), (0,)), ((), ())),
        preferred_element_type=jnp.float32)                       # (TJ, Cin)

    @pl.when(k == pl.num_programs(1) - 1)
    def _():
        # `self.bias + feat` with self.bias == True  ->  add 1.0, then Linear.
        feat2 = acc_ref[...] + 1.0
        out = jnp.dot(feat2, w_ref[...],
                      preferred_element_type=jnp.float32) + b_ref[...]
        o_ref[...] = out.astype(o_ref.dtype)


def gnn_layer(adj, feature, w_lin, b_lin, *, tile_dst=256, tile_src=1024):
    """adj: (N, N) dense adjacency with adj[u, v] = 1 iff edge u -> v (int8/bool/float,
    values must be exactly representable in int8 -- i.e. an unweighted graph).
    feature: (N, Cin); w_lin: (Cin, Cout) (torch weight pre-transposed); b_lin: (1, Cout).
    tile_dst / tile_src must be multiples of 128."""
    N, cin = feature.shape
    cout = w_lin.shape[1]

    # Keep the O(N^2) array in int8 (callers should already store it that way to avoid
    # this cast pass entirely).
    adj_i8 = adj if adj.dtype == jnp.int8 else adj.astype(jnp.int8)

    # Hoisted out-degree normalization: one cheap row-reduce over the int8 adjacency,
    # then pre-scale the features and cast to bf16 once (O(N*Cin)).
    degs = jnp.maximum(jnp.sum(adj_i8, axis=1, keepdims=True, dtype=jnp.float32), 1.0)
    feat_scaled = (feature * lax.rsqrt(degs)).astype(jnp.bfloat16)   # (N, Cin)

    # Tile sizes, clamped so tiny graphs don't over-pad; pad dst/src dims independently
    # (padded src rows are all-zero => contribute nothing; padded dst rows sliced off).
    tj = min(tile_dst, _round_up(N, 128))
    tk = min(tile_src, _round_up(N, 128))
    n_dst_pad = _round_up(N, tj)
    n_src_pad = _round_up(N, tk)
    cout_pad = _round_up(cout, 128)

    a_p = jnp.pad(adj_i8, ((0, n_src_pad - N), (0, n_dst_pad - N)))
    x_p = jnp.pad(feat_scaled, ((0, n_src_pad - N), (0, 0)))
    w_p = jnp.pad(w_lin, ((0, 0), (0, cout_pad - cout)))
    b_p = jnp.pad(b_lin, ((0, 0), (0, cout_pad - cout)))

    grid = (n_dst_pad // tj, n_src_pad // tk)   # (dst tiles, src tiles) — reduction last

    # VMEM budget (double-buffered inputs/outputs + resident features + scratch) and an
    # explicit scoped-VMEM limit so big-TK configs don't hit v5e's 16 MiB default.
    vmem_bytes = (2 * tk * tj * 1                 # A int8 double-buffer
                  + 2 * n_src_pad * cin * 2       # resident bf16 features
                  + 2 * tj * cout_pad * 4         # output double-buffer
                  + 2 * (cin + 1) * cout_pad * 4  # W + b
                  + tj * cin * 4)                 # f32 accumulator scratch
    vmem_limit = int(min(max(2 * vmem_bytes, 32 * 1024 * 1024), 64 * 1024 * 1024))

    cost = pl.CostEstimate(
        flops=2 * n_src_pad * n_dst_pad * cin + 2 * n_dst_pad * cin * cout_pad,
        transcendentals=0,
        bytes_accessed=(n_src_pad * n_dst_pad            # A, int8, read once
                        + n_src_pad * cin * 2            # features (bf16)
                        + n_dst_pad * cout_pad * 4))     # output

    out = pl.pallas_call(
        functools.partial(gnn_layer_kernel, tile_src=tk),
        out_shape=jax.ShapeDtypeStruct((n_dst_pad, cout_pad), feature.dtype),
        grid_spec=pltpu.PrefetchScalarGridSpec(
            num_scalar_prefetch=0,
            grid=grid,
            in_specs=[
                # A tile in natural (src, dst) layout; transpose lives in the index_map.
                pl.BlockSpec((tk, tj), lambda j, k: (k, j)),
                # Whole scaled-feature array resident in VMEM (constant block index).
                pl.BlockSpec((n_src_pad, cin), lambda j, k: (0, 0)),
                pl.BlockSpec((cin, cout_pad), lambda j, k: (0, 0)),   # W (resident)
                pl.BlockSpec((1, cout_pad), lambda j, k: (0, 0)),     # b (resident)
            ],
            out_specs=pl.BlockSpec((tj, cout_pad), lambda j, k: (j, 0)),
            scratch_shapes=[pltpu.VMEM((tj, cin), jnp.float32)],
        ),
        compiler_params=pltpu.CompilerParams(
            dimension_semantics=("parallel", "arbitrary"),
            vmem_limit_bytes=vmem_limit),
        cost_estimate=cost,
    )(a_p, x_p, w_p, b_p)

    return out[:N, :cout]


def reference(adj, feature, w_lin, b_lin):
    degs = jnp.maximum(jnp.sum(adj, axis=1, keepdims=True), 1.0)
    feat = feature * (degs ** -0.5)
    agg = adj.T @ feat
    feat2 = agg + 1.0
    return feat2 @ w_lin + b_lin


if __name__ == "__main__":
    # Small graph, but big enough to exercise a multi-tile (4 dst x 2 src) grid and the
    # ragged-N padding path: 1000 nodes, in_channels=8, out_channels=32.
    N, C_IN, C_OUT = 1000, 8, 32

    key = jax.random.PRNGKey(0)
    k_adj, k_feat, k_w, k_b = jax.random.split(key, 4)

    # deterministic random directed graph, stored directly as int8 (0/1)
    adj = (jax.random.uniform(k_adj, (N, N)) < 0.05).astype(jnp.int8)
    feature = jax.random.normal(k_feat, (N, C_IN), dtype=jnp.float32)

    # nn.Linear(C_IN, C_OUT, bias=True): weight (C_OUT, C_IN), bias (C_OUT,)
    # stored here pre-transposed as (C_IN, C_OUT) and bias as (1, C_OUT)
    bound = 1.0 / (C_IN ** 0.5)
    w_lin = jax.random.uniform(k_w, (C_IN, C_OUT), minval=-bound, maxval=bound,
                               dtype=jnp.float32)
    b_lin = jax.random.uniform(k_b, (1, C_OUT), minval=-bound, maxval=bound,
                               dtype=jnp.float32)

    out = gnn_layer(adj, feature, w_lin, b_lin, tile_dst=256, tile_src=512)
    out = jax.block_until_ready(out)

    ref = reference(adj.astype(jnp.float32), feature, w_lin, b_lin)
    assert out.shape == (N, C_OUT)
    # The aggregation feeds bf16 features to the MXU (adjacency is exact in bf16,
    # accumulation in f32), so tolerance is loosened vs the pure-f32 reference;
    # error grows ~linearly with average in-degree (here ~50).
    assert jnp.allclose(out, ref, atol=5e-2, rtol=5e-2), "mismatch vs reference"

    print("KERNEL_OK")
</pallas_src>

<mosaic_0001>
module attributes {stable_mosaic.version = 11 : i64} {
  func.func @gnn_layer_kernel(%arg0: i32, %arg1: i32, %arg2: memref<512x256xi8, #tpu.memory_space<vmem>>, %arg3: memref<1024x8xbf16, #tpu.memory_space<vmem>>, %arg4: memref<8x128xf32, #tpu.memory_space<vmem>>, %arg5: memref<1x128xf32, #tpu.memory_space<vmem>>, %arg6: memref<256x128xf32, #tpu.memory_space<vmem>>, %arg7: memref<256x8xf32, #tpu.memory_space<vmem>>) attributes {dimension_semantics = [#tpu.dimension_semantics<parallel>, #tpu.dimension_semantics<arbitrary>], iteration_bounds = array<i64: 4, 2>, scalar_prefetch = 0 : i64, scratch_operands = 1 : i64, tpu.core_type = #tpu.core_type<tc>, window_params = [{transform_indices = @transform_0, window_bounds = array<i64: 512, 256>}, {pipeline_mode = #tpu.pipeline_mode<synchronous>, transform_indices = @transform_1, window_bounds = array<i64: 1024, 8>}, {pipeline_mode = #tpu.pipeline_mode<synchronous>, transform_indices = @transform_2, window_bounds = array<i64: 8, 128>}, {pipeline_mode = #tpu.pipeline_mode<synchronous>, transform_indices = @transform_3, window_bounds = array<i64: 1, 128>}, {transform_indices = @transform_4, window_bounds = array<i64: 256, 128>}]} {
    %c0_i32 = arith.constant 0 : i32
    %0 = arith.cmpi eq, %arg1, %c0_i32 : i32
    %1 = arith.extui %0 : i1 to i32
    %c0_i32_0 = arith.constant 0 : i32
    %2 = arith.cmpi ne, %1, %c0_i32_0 : i32
    scf.if %2 {
      %cst_8 = arith.constant 0.000000e+00 : f32
      %16 = vector.broadcast %cst_8 : f32 to vector<256x8xf32>
      %c0_9 = arith.constant 0 : index
      %c0_10 = arith.constant 0 : index
      %17 = vector.load %arg7[%c0_9, %c0_10] : memref<256x8xf32, #tpu.memory_space<vmem>>, vector<256x8xf32>
      tpu.vector_store %arg7[%c0_9, %c0_10], %16 {strides = array<i32>} : memref<256x8xf32, #tpu.memory_space<vmem>>, vector<256x8xf32>,
    } else {
    }
    %c0 = arith.constant 0 : index
    %c0_1 = arith.constant 0 : index
    %3 = vector.load %arg2[%c0, %c0_1] : memref<512x256xi8, #tpu.memory_space<vmem>>, vector<512x256xi8>
    %4 = arith.sitofp %3 : vector<512x256xi8> to vector<512x256xbf16>
    %c512_i32 = arith.constant 512 : i32
    %5 = arith.muli %arg1, %c512_i32 : i32
    %6 = tpu.assume_multiple %5, 512 : i32
    %7 = arith.index_cast %6 : i32 to index
    %c0_2 = arith.constant 0 : index
    %8 = vector.load %arg3[%7, %c0_2] : memref<1024x8xbf16, #tpu.memory_space<vmem>>, vector<512x8xbf16>
    %c0_3 = arith.constant 0 : index
    %c0_4 = arith.constant 0 : index
    %9 = vector.load %arg7[%c0_3, %c0_4] : memref<256x8xf32, #tpu.memory_space<vmem>>, vector<256x8xf32>
    %cst = arith.constant dense<0.000000e+00> : vector<256x8xf32>
    %10 = tpu.matmul %4, %8, %cst {dimension_numbers = #tpu.dot_dimension_numbers<[0], [0], [1], [1], [0, 1, 1, 1], [], []>} : vector<512x256xbf16>, vector<512x8xbf16>, vector<256x8xf32> -> vector<256x8xf32>
    %11 = arith.addf %9, %10 : vector<256x8xf32>
    %c0_5 = arith.constant 0 : index
    %c0_6 = arith.constant 0 : index
    %12 = vector.load %arg7[%c0_5, %c0_6] : memref<256x8xf32, #tpu.memory_space<vmem>>, vector<256x8xf32>
    tpu.vector_store %arg7[%c0_5, %c0_6], %11 {strides = array<i32>} : memref<256x8xf32, #tpu.memory_space<vmem>>, vector<256x8xf32>,
    %c1_i32 = arith.constant 1 : i32
    %13 = arith.cmpi eq, %arg1, %c1_i32 : i32
    %14 = arith.extui %13 : i1 to i32
    %c0_i32_7 = arith.constant 0 : i32
    %15 = arith.cmpi ne, %14, %c0_i32_7 : i32
    scf.if %15 {
      %c0_8 = arith.constant 0 : index
      %c0_9 = arith.constant 0 : index
      %16 = vector.load %arg7[%c0_8, %c0_9] : memref<256x8xf32, #tpu.memory_space<vmem>>, vector<256x8xf32>
      %cst_10 = arith.constant 1.000000e+00 : f32
      %17 = vector.broadcast %cst_10 : f32 to vector<256x8xf32>
      %18 = arith.addf %16, %17 : vector<256x8xf32>
      %c0_11 = arith.constant 0 : index
      %c0_12 = arith.constant 0 : index
      %19 = vector.load %arg4[%c0_11, %c0_12] : memref<8x128xf32, #tpu.memory_space<vmem>>, vector<8x128xf32>
      %cst_13 = arith.constant dense<0.000000e+00> : vector<256x128xf32>
      %20 = tpu.matmul %18, %19, %cst_13 {dimension_numbers = #tpu.dot_dimension_numbers<[1], [0], [0], [1], [0, 0, 1, 1], [], []>} : vector<256x8xf32>, vector<8x128xf32>, vector<256x128xf32> -> vector<256x128xf32>
      %c0_14 = arith.constant 0 : index
      %c0_15 = arith.constant 0 : index
      %21 = vector.load %arg5[%c0_14, %c0_15] : memref<1x128xf32, #tpu.memory_space<vmem>>, vector<1x128xf32>
      %22 = vector.broadcast %21 : vector<1x128xf32> to vector<256x128xf32>
      %23 = arith.addf %20, %22 : vector<256x128xf32>
      %c0_16 = arith.constant 0 : index
      %c0_17 = arith.constant 0 : index
      %24 = vector.load %arg6[%c0_16, %c0_17] : memref<256x128xf32, #tpu.memory_space<vmem>>, vector<256x128xf32>
      tpu.vector_store %arg6[%c0_16, %c0_17], %23 {strides = array<i32>} : memref<256x128xf32, #tpu.memory_space<vmem>>, vector<256x128xf32>,
    } else {
    }
    return
  }
  func.func @transform_0(%arg0: i32, %arg1: i32) -> (i32, i32) {
    %c0_i32 = arith.constant 0 : i32
    return %arg1, %arg0 : i32, i32
  }
  func.func @transform_1(%arg0: i32, %arg1: i32) -> (i32, i32) {
    %c0_i32 = arith.constant 0 : i32
    %c0_i32_0 = arith.constant 0 : i32
    %c0_i32_1 = arith.constant 0 : i32
    return %c0_i32, %c0_i32_0 : i32, i32
  }
  func.func @transform_2(%arg0: i32, %arg1: i32) -> (i32, i32) {
    %c0_i32 = arith.constant 0 : i32
    %c0_i32_0 = arith.constant 0 : i32
    %c0_i32_1 = arith.constant 0 : i32
    return %c0_i32, %c0_i32_0 : i32, i32
  }
  func.func @transform_3(%arg0: i32, %arg1: i32) -> (i32, i32) {
    %c0_i32 = arith.constant 0 : i32
    %c0_i32_0 = arith.constant 0 : i32
    %c0_i32_1 = arith.constant 0 : i32
    return %c0_i32, %c0_i32_0 : i32, i32
  }
  func.func @transform_4(%arg0: i32, %arg1: i32) -> (i32, i32) {
    %c0_i32 = arith.constant 0 : i32
    %c0_i32_0 = arith.constant 0 : i32
    return %arg0, %c0_i32 : i32, i32
  }
}

</mosaic_0001>

<bundles_post_ra>
// kernel: tpu_custom_call.1
= control target key start
LH: loop header
LB: loop body
LE: loop exit
PB: predicated region body
PF: predicated region fallthrough
CT: control target
= control target key end

     0   :  { %9 = vsyncpa [#allocation4], 0  ;;  %s2905_s0 = inlined_call_operand.hbm [shape: s8[1024,1024], index: 0, kind: input, shape index: {}]   ;;  %s2906_s1 = inlined_call_operand.vmem [shape: bf16[1024,8], index: 1, kind: input, shape index: {}]   ;;  %s2907_s2 = inlined_call_operand.vmem [shape: f32[8,128], index: 2, kind: input, shape index: {}]   ;;  %s2908_s3 = inlined_call_operand.vmem [shape: f32[1,128], index: 3, kind: input, shape index: {}]   ;;  %s2909_s4 = inlined_call_operand.hbm [shape: f32[1024,128], index: 4, kind: output, shape index: {}]  }
   0x1   :  { %11 = vsyncpa [#allocation4 + $0x1], 0 }
   0x2   :  { %12 = vsyncpa [#allocation5], 0 }
   0x3   :  { %14 = vsyncpa [#allocation5 + $0x1], 0  ;;  %s2434_s15 = smov 0   ;;  %s2436_s16 = smov 0  }
   0x4   :  { %s2438_s17 = smov 0   ;;  %s2440_s18 = smov 0  }
   0x5   :  { %s2442_s19 = smov 0   ;;  %s2444_s20 = smov 0  }
   0x6   :  { %s2446_s21 = smov 0   ;;  %s2448_s22 = smov 0  }
   0x7   :  { %s2450_s23 = smov 0   ;;  %s2452_s24 = smov 0  }
   0x8   :  { %s2454_s25 = smov 0  }
   0x9 LB: > { %2914 = sst [smem:[#allocation9_spill]] %s2379_s20  ;;  %s1710_s26 = sadd.s32 4294967295, %s2399_s25   ;;  %s2399_s25 = sphi %s2454_s25, %s20_s25   ;;  %s2395_s24 = sphi %s2452_s24, %s2938_s24   ;;  %s2391_s23 = sphi %s2450_s23, %s2937_s23   ;;  %s2387_s22 = sphi %s2448_s22, %s2936_s22   ;;  %s2383_s21 = sphi %s2446_s21, %s2935_s21   ;;  %s2379_s20 = sphi %s2444_s20, %s2927_s20   ;;  %s2375_s19 = sphi %s2442_s19, %s2934_s19   ;;  %s2371_s18 = sphi %s2440_s18, %s2933_s18   ;;  %s2367_s17 = sphi %s2438_s17, %s2932_s17   ;;  %s2363_s16 = sphi %s2436_s16, %s2931_s16   ;;  %s2359_s15 = sphi %s2434_s15, %s2930_s15  }
   0xa   : > { %s1711_s27 = sadd.s32 4294967294, %s2399_s25   ;;  %s29_s28 = sadd.s32 1, %s2391_s23 }
   0xb   : > { %s32_s29 = sadd.s32 1, %s2395_s24  ;;  %p30_p0 = scmp.ge.s32.totalorder %s29_s28, 2 }
   0xc   : > { %s41_s30 = sadd.s32 1, %s2379_s20  ;;  %p48_p1 = scmp.ne.s32.totalorder %s2379_s20, %s2375_s19 }
   0xd   : > { %p49_p2 = scmp.eq.s32.totalorder %s2399_s25, 0  ;;  %s2940_s28 = smov (%p30_p0, %s29_s28), 0 }
   0xe   : > { %2915 = sst [smem:[#allocation10_spill]] %s2940_s28  ;;  %s2942_s29 = smov (!%p30_p0, %s32_s29), %s2395_s24 }
   0xf   : > { %s36_s5 = ssub.s32 %s2391_s23, %s2940_s28  ;;  %p2500_p3 = por %p49_p2, %p48_p1 }
  0x10   : > { %p34_p4 = scmp.ge.s32.totalorder %s2942_s29, 4  ;;  %p54_p5 = scmp.ne.s32.totalorder %s2375_s19, %s2371_s18 }
  0x11   : > { %p55_p6 = scmp.eq.s32.totalorder %s1710_s26, 0  ;;  %s130_s7 = sadd.s32 1, %s2367_s17 }
  0x12   : > { %s2944_s29 = smov (%p34_p4, %s2942_s29), 0  ;;  %p140_p8 = scmp.ne.s32.totalorder %s2367_s17, %s2363_s16 }
  0x13   : > { %2917 = sst [smem:[#allocation11_spill]] %s2944_s29  ;;  %p2508_p7 = por %p55_p6, %p54_p5 }
  0x14   : > { %s37_s9 = ssub.s32 %s2395_s24, %s2944_s29  ;;  %p141_p9 = scmp.eq.s32.totalorder %s1710_s26, 7 }
  0x15   : > { %s38_s10 = sor.u32 %s37_s9, %s36_s5  ;;  %p128_p10 = scmp.eq.s32.totalorder %s37_s9, 0 }
  0x16   : > { %p39_p11 = scmp.eq.s32.totalorder %s38_s10, 0  ;;  %p2516_p12 = por %p141_p9, %p140_p8 }
  0x17   : > { %s2521_s12 = scalar_select %p128_p10, %s2367_s17, %s130_s7  }
  0x18   : > { %s2919_s11 = scalar_select %p2516_p12, 1, 0 }
  0x19   : > { %s2524_s13 = scalar_select %p39_p11, %s2379_s20, %s41_s30  }
  0x1a   : > { %p146_p13 = scmp.ne.s32.totalorder %s2363_s16, %s2359_s15  ;;  %p147_p0 = scmp.eq.s32.totalorder %s1711_s27, 7 }
  0x1b   : > { %2920 = sst [smem:[#allocation12_spill]] %s2524_s13  ;;  %p2119_p1 = scmp.lt.s32.totalorder %s2399_s25, 8 }
  0x1c   : > { %p2529_p2 = por %p147_p0, %p146_p13  ;;  %s176_s18 = sand.u32 1, %s2379_s20  }
  0x1d   : > { %s1714_s26 = sshll.u32 %s176_s18, 8  ;;  %s1716_s5 = sshll.u32 %s2395_s24, 1 }
  0x1e   : > { %s2921_s14 = scalar_select %p2529_p2, 1, 0 }
  0x1f   : > { %s1796_s9 = sshll.u32 %s2391_s23, 7  ;;  %s180_s10 = scalar_lea.vmem [#allocation3], %s1714_s26 }
  0x20   : > { %s190_s29 = sshll.u32 %s180_s10, 4  ;;  %s187_s28 = sadd.s32 %s1796_s9, %s1716_s5  ;;  %s2536_s29 = int_to_ptr.vmem [resolvable:$true] %s190_s29 }
  0x21   : > { %s1718_s7 = sshll.u32 %s187_s28, 7  ;;  %p2540_p4 = pnand %p2119_p1, %p2500_p3 }
  0x22   : > { %s2547_s20 = scalar_lea.hbm %s2905_s0, %s1718_s7  ;;  %s2550_s26 = scalar_lea.sflag [#allocation4], %s176_s18 }
  0x23   : > { %s2247_s28 = scalar_lea.hbm %s2547_s20, 4096  ;;  %p2249_p3 = pneg %p2540_p4 }
  0x24   : > { %p2248_p6 = scmp.ne.s32.totalorder %s2547_s20, %s2247_s28  ;;  %s2252_s5 = scalar_lea.hbm %s2905_s0, 32768 }
  0x25   : > { %p2253_p10 = scmp.lt.u32.totalorder %s2547_s20, %s2905_s0  ;;  %p2254_p11 = scmp.lt.u32.totalorder %s2252_s5, %s2247_s28 }
  0x26   : > { %p2250_p8 = pnand %p2249_p3, %p2248_p6  ;;  %p2256_p0 = scmp.lt.u32.totalorder %s2247_s28, %s2547_s20 }
  0x27   : > { %p2255_p13 = por %p2254_p11, %p2253_p10 }
  0x28   : > { %p2251_p9 = pneg %p2250_p8 }
  0x29   : > { %p2257_p1 = por %p2256_p0, %p2255_p13 }
  0x2b   : > { %p2258_p5 = pnand %p2257_p1, %p2251_p9 }
  0x2d   : > { %2261 = shalt.err (!%p2258_p5)
}
  0x2e   : > { %s2262_s18 = scalar_lea.vmem %s2536_s29, 4096  ;;  %s2401_s7 = smov [#allocation3]  }
  0x2f   : > { %p2263_p6 = scmp.ne.s32.totalorder %s2536_s29, %s2262_s18  ;;  %s2267_s27 = sshll.u32 %s2401_s7, 4  ;;  %s2268_s27 = int_to_ptr.vmem [resolvable:$false] %s2267_s27 }
  0x30   : > { %s2269_s6 = scalar_lea.vmem %s2268_s27, 8192  ;;  %p2270_p12 = scmp.lt.s32.totalorder %s2536_s29, %s2268_s27 }
  0x31   : > { %p2265_p8 = pnand %p2263_p6, %p2249_p3  ;;  %p2271_p10 = scmp.lt.s32.totalorder %s2269_s6, %s2262_s18 }
  0x33   : > { %p2266_p2 = pneg %p2265_p8  ;;  %p2272_p11 = por %p2271_p10, %p2270_p12 }
  0x35   : > { %p2273_p13 = pnand %p2272_p11, %p2266_p2 }
  0x37   : > { %2276 = shalt.err (!%p2273_p13)
}
  0x38   : > { %s2402_s28 = smov 1024   ;;  %s2403_s13 = smov 256  }
  0x39   : > { %s2404_s5 = smov 16   ;;  %p198_p5 = scmp.lt.s32.totalorder %s2399_s25, 9 }
  0x3a   : > { %2114 = dma.hbm_to_vmem [thread:$0]  (!%p2540_p4), %s2547_s20, 4096, %s2536_s29, %s2550_s26, %s2402_s28, %s2403_s13, %s2404_s5  }
  0x3b   : > { %p2923_p3 = scmp.ge.s32.totalorder %s2399_s25, 1 }
  0x3d   : > { %p199_p9 = pnand %p2923_p3, %p198_p5 }
  0x3e   : > { %s204_s9 = sand.u32 (!%p199_p9), 1, %s2375_s19  }
  0x3f   : > { %202 = sbr.rel (%p199_p9) target bundleno = 821 (0x335), region = 36  ;;  %s1720_s10 = sshll.u32 (!%p199_p9), %s204_s9, 8 }
  0x40   : > { %s205_s18 = scalar_lea.sflag (!%p199_p9), [#allocation4], %s204_s9  ;;  %s2582_s7 = scalar_lea.vmem (!%p199_p9), [#allocation3], %s1720_s10 }
  0x46   : > { %2350 = dma.done.wait (%p2508_p7), %s205_s18, 4096  }
  0x47   : > { %2352 = vsyncadd (%p2508_p7), %s205_s18, 4294963200  ;;  %s230_s30 = sand.u32 1, %s2363_s16   ;;  %p1722_p12 = scmp.ne.s32.totalorder %s2383_s21, 0 }
  0x48   : > { %s1721_s20 = sshll.u32 %s230_s30, 8  ;;  %vm241_vm0 = vcmask (!%p1722_p12), 64512   ;;  %v2405_v0 = vmov (!%p1722_p12), 0.0  }
  0x49   : > { %s2591_s29 = scalar_lea.vmem [#allocation6], %s1721_s20  ;;  %240 = sbr.rel (%p1722_p12) target bundleno = 89 (0x59), region = 44  ;;  %242 = vst.msk [vmem:[#allocation2] sm:$0xff] (!%p1722_p12), %vm241_vm0, %v2405_v0  ;;  %243 = vst.msk [vmem:[#allocation2 + $0x8] sm:$0xff] (!%p1722_p12), %vm241_vm0, %v2405_v0 }
  0x4a   : > { %244 = vst.msk [vmem:[#allocation2 + $0x10] sm:$0xff] (!%p1722_p12), %vm241_vm0, %v2405_v0  ;;  %245 = vst.msk [vmem:[#allocation2 + $0x18] sm:$0xff] (!%p1722_p12), %vm241_vm0, %v2405_v0 }
  0x4b   : > { %246 = vst.msk [vmem:[#allocation2 + $0x20] sm:$0xff] (!%p1722_p12), %vm241_vm0, %v2405_v0  ;;  %247 = vst.msk [vmem:[#allocation2 + $0x28] sm:$0xff] (!%p1722_p12), %vm241_vm0, %v2405_v0 }
  0x4c   : > { %248 = vst.msk [vmem:[#allocation2 + $0x30] sm:$0xff] (!%p1722_p12), %vm241_vm0, %v2405_v0  ;;  %249 = vst.msk [vmem:[#allocation2 + $0x38] sm:$0xff] (!%p1722_p12), %vm241_vm0, %v2405_v0 }
  0x4d   : > { %250 = vst.msk [vmem:[#allocation2 + $0x40] sm:$0xff] (!%p1722_p12), %vm241_vm0, %v2405_v0  ;;  %251 = vst.msk [vmem:[#allocation2 + $0x48] sm:$0xff] (!%p1722_p12), %vm241_vm0, %v2405_v0 }
  0x4e   : > { %252 = vst.msk [vmem:[#allocation2 + $0x50] sm:$0xff] (!%p1722_p12), %vm241_vm0, %v2405_v0  ;;  %253 = vst.msk [vmem:[#allocation2 + $0x58] sm:$0xff] (!%p1722_p12), %vm241_vm0, %v2405_v0 }
  0x4f   : > { %254 = vst.msk [vmem:[#allocation2 + $0x60] sm:$0xff] (!%p1722_p12), %vm241_vm0, %v2405_v0  ;;  %255 = vst.msk [vmem:[#allocation2 + $0x68] sm:$0xff] (!%p1722_p12), %vm241_vm0, %v2405_v0 }
  0x50   : > { %256 = vst.msk [vmem:[#allocation2 + $0x70] sm:$0xff] %vm241_vm0, %v2405_v0  ;;  %257 = vst.msk [vmem:[#allocation2 + $0x78] sm:$0xff] %vm241_vm0, %v2405_v0 }
  0x51   : > { %258 = vst.msk [vmem:[#allocation2 + $0x80] sm:$0xff] %vm241_vm0, %v2405_v0  ;;  %259 = vst.msk [vmem:[#allocation2 + $0x88] sm:$0xff] %vm241_vm0, %v2405_v0 }
  0x52   : > { %260 = vst.msk [vmem:[#allocation2 + $0x90] sm:$0xff] %vm241_vm0, %v2405_v0  ;;  %261 = vst.msk [vmem:[#allocation2 + $0x98] sm:$0xff] %vm241_vm0, %v2405_v0 }
  0x53   : > { %262 = vst.msk [vmem:[#allocation2 + $0xa0] sm:$0xff] %vm241_vm0, %v2405_v0  ;;  %263 = vst.msk [vmem:[#allocation2 + $0xa8] sm:$0xff] %vm241_vm0, %v2405_v0 }
  0x54   : > { %264 = vst.msk [vmem:[#allocation2 + $0xb0] sm:$0xff] %vm241_vm0, %v2405_v0  ;;  %265 = vst.msk [vmem:[#allocation2 + $0xb8] sm:$0xff] %vm241_vm0, %v2405_v0 }
  0x55   : > { %266 = vst.msk [vmem:[#allocation2 + $0xc0] sm:$0xff] %vm241_vm0, %v2405_v0  ;;  %267 = vst.msk [vmem:[#allocation2 + $0xc8] sm:$0xff] %vm241_vm0, %v2405_v0 }
  0x56   : > { %268 = vst.msk [vmem:[#allocation2 + $0xd0] sm:$0xff] %vm241_vm0, %v2405_v0  ;;  %269 = vst.msk [vmem:[#allocation2 + $0xd8] sm:$0xff] %vm241_vm0, %v2405_v0 }
  0x57   : > { %270 = vst.msk [vmem:[#allocation2 + $0xe0] sm:$0xff] %vm241_vm0, %v2405_v0  ;;  %271 = vst.msk [vmem:[#allocation2 + $0xe8] sm:$0xff] %vm241_vm0, %v2405_v0 }
  0x58   : > { %272 = vst.msk [vmem:[#allocation2 + $0xf0] sm:$0xff] %vm241_vm0, %v2405_v0  ;;  %273 = vst.msk [vmem:[#allocation2 + $0xf8] sm:$0xff] %vm241_vm0, %v2405_v0 }
  0x59 PF: > { %v298_v1 = vld [vmem:[%s2582_s7 + $0xc0] sm:$0xff]  ;;  %s1723_s8 = sshll.u32 %s2383_s21, 9  ;;  %v300_v7 = vld [vmem:[%s2582_s7 + $0xd0] sm:$0xff]  ;;  %vm1145_vm1 = vcmask 64512   ;;  %p1757_p7 = scmp.ne.s32.totalorder %s2383_s21, 1 }
  0x5a   : > { %v282_v2 = vld [vmem:[%s2582_s7 + $0x40] sm:$0xff]  ;;  %v354_v3 = vunpack.c.l.s8.bf16 %v298_v1  ;;  %s371_s26 = sshra.s32 %s1723_s8, 3  ;;  %v356_v5 = vunpack.c.h.s8.bf16 %v298_v1  ;;  %v284_v8 = vld [vmem:[%s2582_s7 + $0x50] sm:$0xff]  ;;  %v358_v9 = vunpack.c.l.s8.bf16 %v300_v7  ;;  %v360_v14 = vunpack.c.h.s8.bf16 %v300_v7 }
  0x5b   : > { %v322_v4 = vunpack.c.l.s8.bf16 %v282_v2  ;;  %v324_v6 = vunpack.c.h.s8.bf16 %v282_v2  ;;  %s1724_s27 = sshll.u32 %s371_s26, 2  ;;  %v326_v10 = vunpack.c.l.s8.bf16 %v284_v8  ;;  %v302_v12 = vld [vmem:[%s2582_s7 + $0xe0] sm:$0xff]  ;;  %v328_v15 = vunpack.c.h.s8.bf16 %v284_v8  ;;  %v304_v25 = vld [vmem:[%s2582_s7 + $0xf0] sm:$0xff] }
  0x5c   : > { %567 = vxpose.xlu1.c.b16.start [1/8] %v354_v3, 128  ;;  %s2634_s13 = scalar_lea.vmem %s2906_s1, %s1724_s27  ;;  %v286_v17 = vld [vmem:[%s2582_s7 + $0x60] sm:$0xff]  ;;  %v362_v20 = vunpack.c.l.s8.bf16 %v302_v12  ;;  %v288_v26 = vld [vmem:[%s2582_s7 + $0x70] sm:$0xff]  ;;  %v364_v28 = vunpack.c.h.s8.bf16 %v302_v12  ;;  %v366_v34 = vunpack.c.l.s8.bf16 %v304_v25  ;;  %v368_v42 = vunpack.c.h.s8.bf16 %v304_v25 }
  0x5d   : > { %503 = vxpose.xlu0.c.b16.start [1/8] %v322_v4, 128  ;;  %v2215_v11 = vld [vmem:[%s2634_s13 + $0x40] sm:$0xff]   ;;  %v2219_v19 = vld [vmem:[%s2634_s13 + $0x48] sm:$0xff]   ;;  %v330_v21 = vunpack.c.l.s8.bf16 %v286_v17  ;;  %v2223_v27 = vld [vmem:[%s2634_s13 + $0x50] sm:$0xff]   ;;  %v332_v29 = vunpack.c.h.s8.bf16 %v286_v17  ;;  %v334_v35 = vunpack.c.l.s8.bf16 %v288_v26  ;;  %v336_v43 = vunpack.c.h.s8.bf16 %v288_v26 }
  0x5e   : > { %v2216_v13 = vld [vmem:[%s2634_s13 + $0xc0] sm:$0xff]   ;;  %1798 = vmatprep.subr.bf16.mxu0 %v2215_v11  ;;  %v2220_v22 = vld [vmem:[%s2634_s13 + $0xc8] sm:$0xff]   ;;  %v2224_v30 = vld [vmem:[%s2634_s13 + $0xd0] sm:$0xff]  }
  0x5f   : > { %v2217_v16 = vld [vmem:[%s2634_s13] sm:$0xff]   ;;  %1910 = vmatprep.subr.bf16.mxu1 %v2216_v13  ;;  %v2221_v23 = vld [vmem:[%s2634_s13 + $0x8] sm:$0xff]   ;;  %v2225_v31 = vld [vmem:[%s2634_s13 + $0x10] sm:$0xff]  }
  0x60   : > { %568 = vxpose.xlu1.c.b16.cont [2/8] %v356_v5, 128  ;;  %v2218_v18 = vld [vmem:[%s2634_s13 + $0x80] sm:$0xff]   ;;  %1799 = vmatpush3.bf16.msra.mxu0 %v2217_v16  ;;  %v2222_v24 = vld [vmem:[%s2634_s13 + $0x88] sm:$0xff]   ;;  %v2226_v32 = vld [vmem:[%s2634_s13 + $0x90] sm:$0xff]  }
  0x61   : > { %504 = vxpose.xlu0.c.b16.cont [2/8] %v324_v6, 128  ;;  %1911 = vmatpush3.bf16.msra.mxu1 %v2218_v18  ;;  %v2227_v33 = vld [vmem:[%s2634_s13 + $0x58] sm:$0xff]   ;;  %v290_v39 = vld [vmem:[%s2582_s7 + $0x80] sm:$0xff]  ;;  %v2235_v49 = vld [vmem:[%s2634_s13 + $0x68] sm:$0xff]  }
  0x62   : > { %1800 = vmatprep.subr.bf16.mxu0 %v2219_v19  ;;  %1912 = vmatprep.subr.bf16.mxu1 %v2220_v22  ;;  %v2228_v36 = vld [vmem:[%s2634_s13 + $0xd8] sm:$0xff]   ;;  %v274_v40 = vld [vmem:[%s2582_s7] sm:$0xff]  ;;  %v338_v47 = vunpack.c.l.s8.bf16 %v290_v39  ;;  %v2236_v50 = vld [vmem:[%s2634_s13 + $0xe8] sm:$0xff]   ;;  %v340_v55 = vunpack.c.h.s8.bf16 %v290_v39 }
  0x63   : > { %v2229_v37 = vld [vmem:[%s2634_s13 + $0x18] sm:$0xff]   ;;  %v2231_v41 = vld [vmem:[%s2634_s13 + $0x60] sm:$0xff]   ;;  %v306_v48 = vunpack.c.l.s8.bf16 %v274_v40  ;;  %v2237_v51 = vld [vmem:[%s2634_s13 + $0x28] sm:$0xff]   ;;  %v308_v56 = vunpack.c.h.s8.bf16 %v274_v40 }
  0x64   : > { %569 = vxpose.xlu1.c.b16.cont [3/8] %v358_v9, 128  ;;  %1801 = vmatpush3.bf16.msra.mxu0 %v2221_v23  ;;  %v2230_v38 = vld [vmem:[%s2634_s13 + $0x98] sm:$0xff]   ;;  %v2232_v44 = vld [vmem:[%s2634_s13 + $0xe0] sm:$0xff]   ;;  %v292_v52 = vld [vmem:[%s2582_s7 + $0x90] sm:$0xff] }
  0x65   : > { %505 = vxpose.xlu0.c.b16.cont [3/8] %v326_v10, 128  ;;  %1913 = vmatpush3.bf16.msra.mxu1 %v2222_v24  ;;  %v2233_v45 = vld [vmem:[%s2634_s13 + $0x20] sm:$0xff]   ;;  %v276_v53 = vld [vmem:[%s2582_s7 + $0x10] sm:$0xff]  ;;  %v2238_v54 = vld [vmem:[%s2634_s13 + $0xa8] sm:$0xff]   ;;  %v342_v61 = vunpack.c.l.s8.bf16 %v292_v52  ;;  %v344_v3 = vunpack.c.h.s8.bf16 %v292_v52 }
  0x66   : > { %1802 = vmatprep.subr.bf16.mxu0 %v2223_v27  ;;  %1914 = vmatprep.subr.bf16.mxu1 %v2224_v30  ;;  %v2234_v46 = vld [vmem:[%s2634_s13 + $0xa0] sm:$0xff]   ;;  %v2239_v57 = vld [vmem:[%s2634_s13 + $0x70] sm:$0xff]   ;;  %v310_v62 = vunpack.c.l.s8.bf16 %v276_v53  ;;  %v2243_v63 = vld [vmem:[%s2634_s13 + $0x78] sm:$0xff]   ;;  %v312_v4 = vunpack.c.h.s8.bf16 %v276_v53 }
  0x67   : > { %v2240_v58 = vld [vmem:[%s2634_s13 + $0xf0] sm:$0xff]   ;;  %v2244_v0 = vld [vmem:[%s2634_s13 + $0xf8] sm:$0xff]   ;;  %v294_v5 = vld [vmem:[%s2582_s7 + $0xa0] sm:$0xff] }
  0x68   : > { %570 = vxpose.xlu1.c.b16.cont [4/8] %v360_v14, 128  ;;  %1803 = vmatpush3.bf16.msra.mxu0 %v2225_v31  ;;  %v2241_v59 = vld [vmem:[%s2634_s13 + $0x30] sm:$0xff]   ;;  %v2245_v1 = vld [vmem:[%s2634_s13 + $0x38] sm:$0xff]   ;;  %v278_v6 = vld [vmem:[%s2582_s7 + $0x20] sm:$0xff]  ;;  %v346_v7 = vunpack.c.l.s8.bf16 %v294_v5  ;;  %v348_v9 = vunpack.c.h.s8.bf16 %v294_v5 }
  0x69   : > { %506 = vxpose.xlu0.c.b16.cont [4/8] %v328_v15, 128  ;;  %1915 = vmatpush3.bf16.msra.mxu1 %v2226_v32  ;;  %v2242_v60 = vld [vmem:[%s2634_s13 + $0xb0] sm:$0xff]   ;;  %v2246_v2 = vld [vmem:[%s2634_s13 + $0xb8] sm:$0xff]   ;;  %v314_v8 = vunpack.c.l.s8.bf16 %v278_v6  ;;  %v316_v10 = vunpack.c.h.s8.bf16 %v278_v6  ;;  %v299_v17 = vld [vmem:[%s2582_s7 + $0xc8] sm:$0xff] }
  0x6a   : > { %1804 = vmatprep.subr.bf16.mxu0 %v2227_v33  ;;  %1916 = vmatprep.subr.bf16.mxu1 %v2228_v36  ;;  %v296_v11 = vld [vmem:[%s2582_s7 + $0xb0] sm:$0xff]  ;;  %v283_v18 = vld [vmem:[%s2582_s7 + $0x48] sm:$0xff]  ;;  %v355_v19 = vunpack.c.l.s8.bf16 %v299_v17  ;;  %v301_v23 = vld [vmem:[%s2582_s7 + $0xd8] sm:$0xff] }
  0x6b   : > { %v280_v12 = vld [vmem:[%s2582_s7 + $0x30] sm:$0xff]  ;;  %v350_v13 = vunpack.c.l.s8.bf16 %v296_v11  ;;  %v352_v15 = vunpack.c.h.s8.bf16 %v296_v11  ;;  %v325_v22 = vunpack.c.h.s8.bf16 %v283_v18  ;;  %v285_v24 = vld [vmem:[%s2582_s7 + $0x58] sm:$0xff]  ;;  %v359_v25 = vunpack.c.l.s8.bf16 %v301_v23  ;;  %v287_v30 = vld [vmem:[%s2582_s7 + $0x68] sm:$0xff] }
  0x6c   : > { %571 = vxpose.xlu1.c.b16.cont [5/8] %v362_v20, 128  ;;  %1805 = vmatpush3.bf16.msra.mxu0 %v2229_v37  ;;  %v318_v14 = vunpack.c.l.s8.bf16 %v280_v12  ;;  %v320_v16 = vunpack.c.h.s8.bf16 %v280_v12  ;;  %v323_v20 = vunpack.c.l.s8.bf16 %v283_v18  ;;  %v327_v26 = vunpack.c.l.s8.bf16 %v285_v24  ;;  %v289_v36 = vld [vmem:[%s2582_s7 + $0x78] sm:$0xff] }
  0x6d   : > { %507 = vxpose.xlu0.c.b16.cont [5/8] %v330_v21, 128  ;;  %1917 = vmatpush3.bf16.msra.mxu1 %v2230_v38  ;;  %v357_v21 = vunpack.c.h.s8.bf16 %v299_v17  ;;  %v361_v27 = vunpack.c.h.s8.bf16 %v301_v23  ;;  %v331_v32 = vunpack.c.l.s8.bf16 %v287_v30  ;;  %v335_v38 = vunpack.c.l.s8.bf16 %v289_v36 }
  0x6e   : > { %1806 = vmatprep.subr.bf16.mxu0 %v2231_v41  ;;  %1918 = vmatprep.subr.bf16.mxu1 %v2232_v44  ;;  %v337_v40 = vunpack.c.h.s8.bf16 %v289_v36  ;;  %v291_v41 = vld [vmem:[%s2582_s7 + $0x88] sm:$0xff] }
  0x70   : > { %572 = vxpose.xlu1.c.b16.cont [6/8] %v364_v28, 128  ;;  %1807 = vmatpush3.bf16.msra.mxu0 %v2233_v45  ;;  %v329_v28 = vunpack.c.h.s8.bf16 %v285_v24  ;;  %v341_v45 = vunpack.c.h.s8.bf16 %v291_v41 }
  0x71   : > { %508 = vxpose.xlu0.c.b16.cont [6/8] %v332_v29, 128  ;;  %1919 = vmatpush3.bf16.msra.mxu1 %v2234_v46  ;;  %v303_v29 = vld [vmem:[%s2582_s7 + $0xe8] sm:$0xff] }
  0x72   : > { %1808 = vmatprep.subr.bf16.mxu0 %v2235_v49  ;;  %1920 = vmatprep.subr.bf16.mxu1 %v2236_v50  ;;  %v363_v31 = vunpack.c.l.s8.bf16 %v303_v29  ;;  %v365_v33 = vunpack.c.h.s8.bf16 %v303_v29 }
  0x74   : > { %573 = vxpose.xlu1.c.b16.cont [7/8] %v366_v34, 128  ;;  %1809 = vmatpush3.bf16.msra.mxu0 %v2237_v51  ;;  %v333_v34 = vunpack.c.h.s8.bf16 %v287_v30 }
  0x75   : > { %509 = vxpose.xlu0.c.b16.cont [7/8] %v334_v35, 128  ;;  %1921 = vmatpush3.bf16.msra.mxu1 %v2238_v54  ;;  %v305_v35 = vld [vmem:[%s2582_s7 + $0xf8] sm:$0xff] }
  0x76   : > { %1810 = vmatprep.subr.bf16.mxu0 %v2239_v57  ;;  %1922 = vmatprep.subr.bf16.mxu1 %v2240_v58  ;;  %v367_v37 = vunpack.c.l.s8.bf16 %v305_v35  ;;  %v369_v39 = vunpack.c.h.s8.bf16 %v305_v35 }
  0x78   : > { %574 = vxpose.xlu1.c.b16.end [8/8] %v368_v42, 128  ;;  %1811 = vmatpush3.bf16.msra.mxu0 %v2241_v59  ;;  %v275_v42 = vld [vmem:[%s2582_s7 + $0x8] sm:$0xff] }
  0x79   : > { %510 = vxpose.xlu0.c.b16.end [8/8] %v336_v43, 128  ;;  %1923 = vmatpush3.bf16.msra.mxu1 %v2242_v60  ;;  %v339_v43 = vunpack.c.l.s8.bf16 %v291_v41  ;;  %v307_v44 = vunpack.c.l.s8.bf16 %v275_v42  ;;  %v309_v46 = vunpack.c.h.s8.bf16 %v275_v42 }
  0x7a   : > { %1812 = vmatprep.subr.bf16.mxu0 %v2243_v63  ;;  %1924 = vmatprep.subr.bf16.mxu1 %v2244_v0 }
  0x7c   : > { %535 = vxpose.xlu1.c.b16.start [1/8] %v338_v47, 128  ;;  %1813 = vmatpush3.bf16.msra.mxu0 %v2245_v1  ;;  %v293_v47 = vld [vmem:[%s2582_s7 + $0x98] sm:$0xff] }
  0x7d   : > { %471 = vxpose.xlu0.c.b16.start [1/8] %v306_v48, 128  ;;  %1925 = vmatpush3.bf16.msra.mxu1 %v2246_v2  ;;  %v277_v48 = vld [vmem:[%s2582_s7 + $0x18] sm:$0xff]  ;;  %v343_v49 = vunpack.c.l.s8.bf16 %v293_v47  ;;  %v345_v53 = vunpack.c.h.s8.bf16 %v293_v47 }
  0x7e   : > { %v311_v50 = vunpack.c.l.s8.bf16 %v277_v48  ;;  %v313_v54 = vunpack.c.h.s8.bf16 %v277_v48  ;;  %v297_v1 = vld [vmem:[%s2582_s7 + $0xb8] sm:$0xff] }
  0x7f   : > { %v281_v2 = vld [vmem:[%s2582_s7 + $0x38] sm:$0xff]  ;;  %v351_v5 = vunpack.c.l.s8.bf16 %v297_v1 }
  0x80   : > { %536 = vxpose.xlu1.c.b16.cont [2/8] %v340_v55, 128  ;;  %v295_v55 = vld [vmem:[%s2582_s7 + $0xa8] sm:$0xff]  ;;  %v319_v6 = vunpack.c.l.s8.bf16 %v281_v2 }
  0x81   : > { %472 = vxpose.xlu0.c.b16.cont [2/8] %v308_v56, 128  ;;  %v279_v56 = vld [vmem:[%s2582_s7 + $0x28] sm:$0xff]  ;;  %v347_v59 = vunpack.c.l.s8.bf16 %v295_v55  ;;  %v349_v63 = vunpack.c.h.s8.bf16 %v295_v55 }
  0x82   : > { %v315_v60 = vunpack.c.l.s8.bf16 %v279_v56  ;;  %v317_v0 = vunpack.c.h.s8.bf16 %v279_v56 }
  0x84   : > { %537 = vxpose.xlu1.c.b16.cont [3/8] %v342_v61, 128 }
  0x85   : > { %473 = vxpose.xlu0.c.b16.cont [3/8] %v310_v62, 128 }
  0x88   : > { %538 = vxpose.xlu1.c.b16.cont [4/8] %v344_v3, 128 }
  0x89   : > { %474 = vxpose.xlu0.c.b16.cont [4/8] %v312_v4, 128 }
  0x8c   : > { %539 = vxpose.xlu1.c.b16.cont [5/8] %v346_v7, 128 }
  0x8d   : > { %475 = vxpose.xlu0.c.b16.cont [5/8] %v314_v8, 128 }
  0x90   : > { %540 = vxpose.xlu1.c.b16.cont [6/8] %v348_v9, 128  ;;  %v353_v9 = vunpack.c.h.s8.bf16 %v297_v1 }
  0x91   : > { %476 = vxpose.xlu0.c.b16.cont [6/8] %v316_v10, 128  ;;  %v321_v10 = vunpack.c.h.s8.bf16 %v281_v2 }
  0x94   : > { %541 = vxpose.xlu1.c.b16.cont [7/8] %v350_v13, 128 }
  0x95   : > { %477 = vxpose.xlu0.c.b16.cont [7/8] %v318_v14, 128 }
  0x98   : > { %542 = vxpose.xlu1.c.b16.end [8/8] %v352_v15, 128 }
  0x99   : > { %478 = vxpose.xlu0.c.b16.end [8/8] %v320_v16, 128 }
  0x9c   : > { %583 = vxpose.xlu1.c.b16.start [1/8] %v355_v19, 128 }
  0x9d   : > { %519 = vxpose.xlu0.c.b16.start [1/8] %v323_v20, 128 }
  0xa0   : > { %584 = vxpose.xlu1.c.b16.cont [2/8] %v357_v21, 128 }
  0xa1   : > { %520 = vxpose.xlu0.c.b16.cont [2/8] %v325_v22, 128 }
  0xa4   : > { %585 = vxpose.xlu1.c.b16.cont [3/8] %v359_v25, 128 }
  0xa5   : > { %521 = vxpose.xlu0.c.b16.cont [3/8] %v327_v26, 128 }
  0xa8   : > { %586 = vxpose.xlu1.c.b16.cont [4/8] %v361_v27, 128 }
  0xa9   : > { %522 = vxpose.xlu0.c.b16.cont [4/8] %v329_v28, 128 }
  0xac   : > { %587 = vxpose.xlu1.c.b16.cont [5/8] %v363_v31, 128 }
  0xad   : > { %523 = vxpose.xlu0.c.b16.cont [5/8] %v331_v32, 128 }
  0xb0   : > { %588 = vxpose.xlu1.c.b16.cont [6/8] %v365_v33, 128 }
  0xb1   : > { %524 = vxpose.xlu0.c.b16.cont [6/8] %v333_v34, 128 }
  0xb4   : > { %589 = vxpose.xlu1.c.b16.cont [7/8] %v367_v37, 128 }
  0xb5   : > { %525 = vxpose.xlu0.c.b16.cont [7/8] %v335_v38, 128 }
  0xb8   : > { %590 = vxpose.xlu1.c.b16.end [8/8] %v369_v39, 128 }
  0xb9   : > { %526 = vxpose.xlu0.c.b16.end [8/8] %v337_v40, 128 }
  0xbc   : > { %551 = vxpose.xlu1.c.b16.start [1/8] %v339_v43, 128 }
  0xbd   : > { %487 = vxpose.xlu0.c.b16.start [1/8] %v307_v44, 128 }
  0xc0   : > { %552 = vxpose.xlu1.c.b16.cont [2/8] %v341_v45, 128 }
  0xc1   : > { %488 = vxpose.xlu0.c.b16.cont [2/8] %v309_v46, 128 }
  0xc2   : > { %v575_v51 = vpop.trf.xlu1 }
  0xc3   : > { %v511_v52 = vpop.trf.xlu0  ;;  %984 = vmatprep.mubr.bf16.mxu1 %v575_v51 }
  0xc4   : > { %823 = vmatprep.mubr.bf16.mxu0 %v511_v52  ;;  %553 = vxpose.xlu1.c.b16.cont [3/8] %v343_v49, 128 }
  0xc5   : > { %489 = vxpose.xlu0.c.b16.cont [3/8] %v311_v50, 128 }
  0xc6   : > { %v576_v57 = vpop.trf.xlu1 }
  0xc7   : > { %v512_v58 = vpop.trf.xlu0 }
  0xc8   : > { %554 = vxpose.xlu1.c.b16.cont [4/8] %v345_v53, 128 }
  0xc9   : > { %490 = vxpose.xlu0.c.b16.cont [4/8] %v313_v54, 128 }
  0xca   : > { %v577_v61 = vpop.trf.xlu1 }
  0xcb   : > { %v513_v62 = vpop.trf.xlu0 }
  0xcc   : > { %555 = vxpose.xlu1.c.b16.cont [5/8] %v347_v59, 128 }
  0xcd   : > { %491 = vxpose.xlu0.c.b16.cont [5/8] %v315_v60, 128 }
  0xce   : > { %v578_v3 = vpop.trf.xlu1 }
  0xcf   : > { %v514_v4 = vpop.trf.xlu0 }
  0xd0   : > { %556 = vxpose.xlu1.c.b16.cont [6/8] %v349_v63, 128 }
  0xd1   : > { %492 = vxpose.xlu0.c.b16.cont [6/8] %v317_v0, 128 }
  0xd2   : > { %v579_v7 = vpop.trf.xlu1 }
  0xd3   : > { %v515_v8 = vpop.trf.xlu0 }
  0xd4   : > { %557 = vxpose.xlu1.c.b16.cont [7/8] %v351_v5, 128 }
  0xd5   : > { %493 = vxpose.xlu0.c.b16.cont [7/8] %v319_v6, 128 }
  0xd6   : > { %v580_v11 = vpop.trf.xlu1 }
  0xd7   : > { %v516_v12 = vpop.trf.xlu0 }
  0xd8   : > { %558 = vxpose.xlu1.c.b16.end [8/8] %v353_v9, 128  ;;  %v439_v9 = vld [vmem:[#allocation2] sm:$0xff] }
  0xd9   : > { %494 = vxpose.xlu0.c.b16.end [8/8] %v321_v10, 128 }
  0xda   : > { %v581_v13 = vpop.trf.xlu1 }
  0xdb   : > { %v517_v14 = vpop.trf.xlu0 }
  0xde   : > { %v582_v15 = vpop.trf.xlu1 }
  0xdf   : > { %v518_v16 = vpop.trf.xlu0 }
  0xe2   : > { %v543_v17 = vpop.trf.xlu1 }
  0xe3   : > { %v479_v18 = vpop.trf.xlu0  ;;  %985 = vmatmul.mubr.bf16.vlgmr.msra.gmra.mrb[0].mxu1 %v543_v17 }
  0xe4   : > { %824 = vmatmul.mubr.bf16.vlgmr.msra.gmra.mrb[0].mxu0 %v479_v18  ;;  %992 = vmatprep.mubr.bf16.mxu1 %v576_v57 }
  0xe5   : > { %831 = vmatprep.mubr.bf16.mxu0 %v512_v58 }
  0xe6   : > { %v544_v19 = vpop.trf.xlu1 }
  0xe7   : > { %v480_v20 = vpop.trf.xlu0 }
  0xea   : > { %v545_v21 = vpop.trf.xlu1 }
  0xeb   : > { %v481_v22 = vpop.trf.xlu0  ;;  %993 = vmatmul.mubr.bf16.gmra.mrb[4].mxu1 %v544_v19 }
  0xec   : > { %832 = vmatmul.mubr.bf16.gmra.mrb[4].mxu0 %v480_v20  ;;  %1000 = vmatprep.mubr.bf16.mxu1 %v577_v61 }
  0xed   : > { %839 = vmatprep.mubr.bf16.mxu0 %v513_v62 }
  0xee   : > { %v546_v23 = vpop.trf.xlu1 }
  0xef   : > { %v482_v24 = vpop.trf.xlu0 }
  0xf2   : > { %v547_v25 = vpop.trf.xlu1 }
  0xf3   : > { %v483_v26 = vpop.trf.xlu0  ;;  %1001 = vmatmul.mubr.bf16.gmra.mrb[8].mxu1 %v545_v21 }
  0xf4   : > { %840 = vmatmul.mubr.bf16.gmra.mrb[8].mxu0 %v481_v22  ;;  %1008 = vmatprep.mubr.bf16.mxu1 %v578_v3 }
  0xf5   : > { %847 = vmatprep.mubr.bf16.mxu0 %v514_v4 }
  0xf6   : > { %v548_v27 = vpop.trf.xlu1 }
  0xf7   : > { %v484_v28 = vpop.trf.xlu0 }
  0xfa   : > { %v549_v29 = vpop.trf.xlu1 }
  0xfb   : > { %v485_v30 = vpop.trf.xlu0  ;;  %1009 = vmatmul.mubr.bf16.gmra.mrb[12].mxu1 %v546_v23 }
  0xfc   : > { %848 = vmatmul.mubr.bf16.gmra.mrb[12].mxu0 %v482_v24  ;;  %1016 = vmatprep.mubr.bf16.mxu1 %v579_v7 }
  0xfd   : > { %855 = vmatprep.mubr.bf16.mxu0 %v515_v8 }
  0xfe   : > { %v550_v31 = vpop.trf.xlu1 }
  0xff   : > { %v486_v32 = vpop.trf.xlu0 }
 0x102   : > { %v591_v33 = vpop.trf.xlu1 }
 0x103   : > { %v527_v34 = vpop.trf.xlu0  ;;  %1017 = vmatmul.mubr.bf16.gmra.mrb[16].mxu1 %v547_v25 }
 0x104   : > { %856 = vmatmul.mubr.bf16.gmra.mrb[16].mxu0 %v483_v26  ;;  %1024 = vmatprep.mubr.bf16.mxu1 %v580_v11 }
 0x105   : > { %863 = vmatprep.mubr.bf16.mxu0 %v516_v12 }
 0x106   : > { %v592_v35 = vpop.trf.xlu1 }
 0x107   : > { %v528_v36 = vpop.trf.xlu0 }
 0x10a   : > { %v593_v37 = vpop.trf.xlu1 }
 0x10b   : > { %v529_v38 = vpop.trf.xlu0  ;;  %1025 = vmatmul.mubr.bf16.gmra.mrb[20].mxu1 %v548_v27  ;;  %v441_v27 = vld [vmem:[#allocation2 + $0x10] sm:$0xff] }
 0x10c   : > { %864 = vmatmul.mubr.bf16.gmra.mrb[20].mxu0 %v484_v28  ;;  %1032 = vmatprep.mubr.bf16.mxu1 %v581_v13 }
 0x10d   : > { %871 = vmatprep.mubr.bf16.mxu0 %v517_v14 }
 0x10e   : > { %v594_v39 = vpop.trf.xlu1 }
 0x10f   : > { %v530_v40 = vpop.trf.xlu0 }
 0x112   : > { %v595_v41 = vpop.trf.xlu1 }
 0x113   : > { %v531_v42 = vpop.trf.xlu0  ;;  %1033 = vmatmul.mubr.bf16.gmra.mrb[24].mxu1 %v549_v29 }
 0x114   : > { %872 = vmatmul.mubr.bf16.gmra.mrb[24].mxu0 %v485_v30  ;;  %1040 = vmatprep.mubr.bf16.mxu1 %v582_v15  ;;  %v440_v15 = vld [vmem:[#allocation2 + $0x8] sm:$0xff] }
 0x115   : > { %879 = vmatprep.mubr.bf16.mxu0 %v518_v16 }
 0x116   : > { %v596_v43 = vpop.trf.xlu1 }
 0x117   : > { %v532_v44 = vpop.trf.xlu0 }
 0x11a   : > { %v597_v45 = vpop.trf.xlu1 }
 0x11b   : > { %v533_v46 = vpop.trf.xlu0  ;;  %1041 = vmatmul.mubr.bf16.gmra.mrb[28].mxu1 %v550_v31 }
 0x11c   : > { %880 = vmatmul.mubr.bf16.gmra.mrb[28].mxu0 %v486_v32  ;;  %1048 = vmatprep.mubr.bf16.mxu1 %v591_v33  ;;  %v442_v33 = vld [vmem:[#allocation2 + $0x18] sm:$0xff] }
 0x11d   : > { %887 = vmatprep.mubr.bf16.mxu0 %v527_v34 }
 0x11e   : > { %v598_v47 = vpop.trf.xlu1 }
 0x11f   : > { %v534_v48 = vpop.trf.xlu0 }
 0x122   : > { %v559_v49 = vpop.trf.xlu1 }
 0x123   : > { %v495_v50 = vpop.trf.xlu0  ;;  %1049 = vmatmul.mubr.bf16.gmra.mrb[32].mxu1 %v559_v49 }
 0x124   : > { %888 = vmatmul.mubr.bf16.gmra.mrb[32].mxu0 %v495_v50  ;;  %1056 = vmatprep.mubr.bf16.mxu1 %v592_v35 }
 0x125   : > { %895 = vmatprep.mubr.bf16.mxu0 %v528_v36 }
 0x126   : > { %v560_v51 = vpop.trf.xlu1 }
 0x127   : > { %v496_v52 = vpop.trf.xlu0 }
 0x12a   : > { %v561_v53 = vpop.trf.xlu1 }
 0x12b   : > { %1057 = vmatmul.mubr.bf16.gmra.mrb[36].mxu1 %v560_v51  ;;  %v497_v54 = vpop.trf.xlu0  ;;  %v444_v51 = vld [vmem:[#allocation2 + $0x28] sm:$0xff] }
 0x12c   : > { %896 = vmatmul.mubr.bf16.gmra.mrb[36].mxu0 %v496_v52  ;;  %1064 = vmatprep.mubr.bf16.mxu1 %v593_v37 }
 0x12d   : > { %903 = vmatprep.mubr.bf16.mxu0 %v529_v38 }
 0x12e   : > { %v562_v55 = vpop.trf.xlu1 }
 0x12f   : > { %v498_v56 = vpop.trf.xlu0 }
 0x132   : > { %v563_v57 = vpop.trf.xlu1 }
 0x133   : > { %1065 = vmatmul.mubr.bf16.gmra.mrb[40].mxu1 %v561_v53  ;;  %v499_v58 = vpop.trf.xlu0 }
 0x134   : > { %904 = vmatmul.mubr.bf16.gmra.mrb[40].mxu0 %v497_v54  ;;  %1072 = vmatprep.mubr.bf16.mxu1 %v594_v39 }
 0x135   : > { %911 = vmatprep.mubr.bf16.mxu0 %v530_v40 }
 0x136   : > { %v564_v59 = vpop.trf.xlu1 }
 0x137   : > { %v500_v60 = vpop.trf.xlu0 }
 0x13a   : > { %v565_v61 = vpop.trf.xlu1 }
 0x13b   : > { %1073 = vmatmul.mubr.bf16.gmra.mrb[44].mxu1 %v562_v55  ;;  %v501_v62 = vpop.trf.xlu0 }
 0x13c   : > { %912 = vmatmul.mubr.bf16.gmra.mrb[44].mxu0 %v498_v56  ;;  %1080 = vmatprep.mubr.bf16.mxu1 %v595_v41 }
 0x13d   : > { %919 = vmatprep.mubr.bf16.mxu0 %v531_v42 }
 0x13e   : > { %v566_v63 = vpop.trf.xlu1 }
 0x13f   : > { %v502_v0 = vpop.trf.xlu0 }
 0x143   : > { %1081 = vmatmul.mubr.bf16.gmra.mrb[48].mxu1 %v563_v57 }
 0x144   : > { %920 = vmatmul.mubr.bf16.gmra.mrb[48].mxu0 %v499_v58  ;;  %1088 = vmatprep.mubr.bf16.mxu1 %v596_v43 }
 0x145   : > { %927 = vmatprep.mubr.bf16.mxu0 %v532_v44 }
 0x14b   : > { %1089 = vmatmul.mubr.bf16.gmra.mrb[52].mxu1 %v564_v59 }
 0x14c   : > { %928 = vmatmul.mubr.bf16.gmra.mrb[52].mxu0 %v500_v60  ;;  %1096 = vmatprep.mubr.bf16.mxu1 %v597_v45  ;;  %v443_v45 = vld [vmem:[#allocation2 + $0x20] sm:$0xff] }
 0x14d   : > { %935 = vmatprep.mubr.bf16.mxu0 %v533_v46 }
 0x153   : > { %1097 = vmatmul.mubr.bf16.gmra.mrb[56].mxu1 %v565_v61 }
 0x154   : > { %936 = vmatmul.mubr.bf16.gmra.mrb[56].mxu0 %v501_v62  ;;  %1104 = vmatprep.mubr.bf16.mxu1 %v598_v47 }
 0x155   : > { %943 = vmatprep.mubr.bf16.mxu0 %v534_v48 }
 0x15b   : > { %1105 = vmatmul.mubr.bf16.gmra.mrb[60].mxu1 %v566_v63  ;;  %v445_v63 = vld [vmem:[#allocation2 + $0x30] sm:$0xff] }
 0x15c   : > { %944 = vmatmul.mubr.bf16.gmra.mrb[60].mxu0 %v502_v0 }
 0x1b6   : > { %v1926_v2 = vpop.f32.mrb[0].mxu1 }
 0x1b7   : > { %v1814_v1 = vpop.f32.mrb[0].mxu0  ;;  %v1927_v4 = vpop.f32.mrb[1].mxu1 }
 0x1b8   : > { %v1815_v3 = vpop.f32.mrb[1].mxu0  ;;  %v1928_v6 = vadd.f32 %v1927_v4, %v1926_v2  ;;  %v1929_v8 = vpop.f32.mrb[2].mxu1 }
 0x1b9   : > { %v1816_v5 = vadd.f32 %v1815_v3, %v1814_v1  ;;  %v1817_v7 = vpop.f32.mrb[2].mxu0  ;;  %v1930_v11 = vpop.f32.mrb[3].mxu1 }
 0x1ba   : > { %v1818_v10 = vpop.f32.mrb[3].mxu0  ;;  %v1931_v14 = vadd.f32 %v1930_v11, %v1929_v8 }
 0x1bb   : > { %v987_v12 = vadd.f32 %v1928_v6, %v1816_v5  ;;  %v1819_v13 = vadd.f32 %v1818_v10, %v1817_v7  ;;  %v446_v5 = vld [vmem:[#allocation2 + $0x38] sm:$0xff] }
 0x1bd   : > { %v1113_v16 = vadd.f32 %v987_v12, %v439_v9  ;;  %v990_v17 = vadd.f32 %v1931_v14, %v1819_v13 }
 0x1be   : > { %v1932_v20 = vpop.f32.mrb[4].mxu1 }
 0x1bf   : > { %1146 = vst.msk [vmem:[#allocation2] sm:$0xff] %vm1145_vm1, %v1113_v16  ;;  %v1114_v18 = vadd.f32 %v990_v17, %v440_v15  ;;  %v1820_v19 = vpop.f32.mrb[4].mxu0  ;;  %v1933_v22 = vpop.f32.mrb[5].mxu1  ;;  %v447_v17 = vld [vmem:[#allocation2 + $0x40] sm:$0xff] }
 0x1c0   : > { %v1821_v21 = vpop.f32.mrb[5].mxu0  ;;  %v1934_v24 = vadd.f32 %v1933_v22, %v1932_v20  ;;  %v1935_v26 = vpop.f32.mrb[6].mxu1 }
 0x1c1   : > { %1147 = vst.msk [vmem:[#allocation2 + $0x8] sm:$0xff] %vm1145_vm1, %v1114_v18  ;;  %v1822_v23 = vadd.f32 %v1821_v21, %v1820_v19  ;;  %v1823_v25 = vpop.f32.mrb[6].mxu0  ;;  %v1936_v29 = vpop.f32.mrb[7].mxu1 }
 0x1c2   : > { %v1824_v28 = vpop.f32.mrb[7].mxu0  ;;  %v1937_v32 = vadd.f32 %v1936_v29, %v1935_v26 }
 0x1c3   : > { %v995_v30 = vadd.f32 %v1934_v24, %v1822_v23  ;;  %v1825_v31 = vadd.f32 %v1824_v28, %v1823_v25  ;;  %v448_v23 = vld [vmem:[#allocation2 + $0x48] sm:$0xff] }
 0x1c5   : > { %v1115_v34 = vadd.f32 %v995_v30, %v441_v27  ;;  %v998_v35 = vadd.f32 %v1937_v32, %v1825_v31 }
 0x1c6   : > { %v1938_v38 = vpop.f32.mrb[8].mxu1 }
 0x1c7   : > { %1148 = vst.msk [vmem:[#allocation2 + $0x10] sm:$0xff] %vm1145_vm1, %v1115_v34  ;;  %v1116_v36 = vadd.f32 %v998_v35, %v442_v33  ;;  %v1826_v37 = vpop.f32.mrb[8].mxu0  ;;  %v1939_v40 = vpop.f32.mrb[9].mxu1  ;;  %v449_v35 = vld [vmem:[#allocation2 + $0x50] sm:$0xff] }
 0x1c8   : > { %v1827_v39 = vpop.f32.mrb[9].mxu0  ;;  %v1940_v42 = vadd.f32 %v1939_v40, %v1938_v38  ;;  %v1941_v44 = vpop.f32.mrb[10].mxu1 }
 0x1c9   : > { %1149 = vst.msk [vmem:[#allocation2 + $0x18] sm:$0xff] %vm1145_vm1, %v1116_v36  ;;  %v1828_v41 = vadd.f32 %v1827_v39, %v1826_v37  ;;  %v1829_v43 = vpop.f32.mrb[10].mxu0  ;;  %v1942_v47 = vpop.f32.mrb[11].mxu1 }
 0x1ca   : > { %v1830_v46 = vpop.f32.mrb[11].mxu0  ;;  %v1943_v50 = vadd.f32 %v1942_v47, %v1941_v44 }
 0x1cb   : > { %v1003_v48 = vadd.f32 %v1940_v42, %v1828_v41  ;;  %v1831_v49 = vadd.f32 %v1830_v46, %v1829_v43  ;;  %v450_v41 = vld [vmem:[#allocation2 + $0x58] sm:$0xff] }
 0x1cd   : > { %v1117_v52 = vadd.f32 %v1003_v48, %v443_v45  ;;  %v1006_v53 = vadd.f32 %v1943_v50, %v1831_v49 }
 0x1ce   : > { %v1944_v56 = vpop.f32.mrb[12].mxu1 }
 0x1cf   : > { %1150 = vst.msk [vmem:[#allocation2 + $0x20] sm:$0xff] %vm1145_vm1, %v1117_v52  ;;  %v1118_v54 = vadd.f32 %v1006_v53, %v444_v51  ;;  %v1832_v55 = vpop.f32.mrb[12].mxu0  ;;  %v1945_v58 = vpop.f32.mrb[13].mxu1  ;;  %v451_v53 = vld [vmem:[#allocation2 + $0x60] sm:$0xff] }
 0x1d0   : > { %v1833_v57 = vpop.f32.mrb[13].mxu0  ;;  %v1946_v60 = vadd.f32 %v1945_v58, %v1944_v56  ;;  %v1947_v62 = vpop.f32.mrb[14].mxu1 }
 0x1d1   : > { %1151 = vst.msk [vmem:[#allocation2 + $0x28] sm:$0xff] %vm1145_vm1, %v1118_v54  ;;  %v1834_v59 = vadd.f32 %v1833_v57, %v1832_v55  ;;  %v1835_v61 = vpop.f32.mrb[14].mxu0  ;;  %v1948_v1 = vpop.f32.mrb[15].mxu1 }
 0x1d2   : > { %v1836_v0 = vpop.f32.mrb[15].mxu0  ;;  %v1949_v4 = vadd.f32 %v1948_v1, %v1947_v62 }
 0x1d3   : > { %v1011_v2 = vadd.f32 %v1946_v60, %v1834_v59  ;;  %v1837_v3 = vadd.f32 %v1836_v0, %v1835_v61  ;;  %v452_v59 = vld [vmem:[#allocation2 + $0x68] sm:$0xff] }
 0x1d5   : > { %v1119_v6 = vadd.f32 %v1011_v2, %v445_v63  ;;  %v1014_v7 = vadd.f32 %v1949_v4, %v1837_v3 }
 0x1d6   : > { %v1950_v10 = vpop.f32.mrb[16].mxu1 }
 0x1d7   : > { %1152 = vst.msk [vmem:[#allocation2 + $0x30] sm:$0xff] %vm1145_vm1, %v1119_v6  ;;  %v1120_v8 = vadd.f32 %v1014_v7, %v446_v5  ;;  %v1838_v9 = vpop.f32.mrb[16].mxu0  ;;  %v1951_v12 = vpop.f32.mrb[17].mxu1  ;;  %v453_v7 = vld [vmem:[#allocation2 + $0x70] sm:$0xff] }
 0x1d8   : > { %v1839_v11 = vpop.f32.mrb[17].mxu0  ;;  %v1952_v14 = vadd.f32 %v1951_v12, %v1950_v10  ;;  %v1953_v16 = vpop.f32.mrb[18].mxu1 }
 0x1d9   : > { %1153 = vst.msk [vmem:[#allocation2 + $0x38] sm:$0xff] %vm1145_vm1, %v1120_v8  ;;  %v1840_v13 = vadd.f32 %v1839_v11, %v1838_v9  ;;  %v1841_v15 = vpop.f32.mrb[18].mxu0  ;;  %v1954_v19 = vpop.f32.mrb[19].mxu1 }
 0x1da   : > { %v1842_v18 = vpop.f32.mrb[19].mxu0  ;;  %v1955_v22 = vadd.f32 %v1954_v19, %v1953_v16 }
 0x1db   : > { %v1019_v20 = vadd.f32 %v1952_v14, %v1840_v13  ;;  %v1843_v21 = vadd.f32 %v1842_v18, %v1841_v15  ;;  %v454_v13 = vld [vmem:[#allocation2 + $0x78] sm:$0xff] }
 0x1dd   : > { %v1121_v24 = vadd.f32 %v1019_v20, %v447_v17  ;;  %v1022_v25 = vadd.f32 %v1955_v22, %v1843_v21 }
 0x1de   : > { %v1956_v28 = vpop.f32.mrb[20].mxu1 }
 0x1df   : > { %1154 = vst.msk [vmem:[#allocation2 + $0x40] sm:$0xff] %vm1145_vm1, %v1121_v24  ;;  %v1122_v26 = vadd.f32 %v1022_v25, %v448_v23  ;;  %v1844_v27 = vpop.f32.mrb[20].mxu0  ;;  %v1957_v30 = vpop.f32.mrb[21].mxu1  ;;  %v455_v25 = vld [vmem:[#allocation2 + $0x80] sm:$0xff] }
 0x1e0   : > { %v1845_v29 = vpop.f32.mrb[21].mxu0  ;;  %v1958_v32 = vadd.f32 %v1957_v30, %v1956_v28  ;;  %v1959_v34 = vpop.f32.mrb[22].mxu1 }
 0x1e1   : > { %1155 = vst.msk [vmem:[#allocation2 + $0x48] sm:$0xff] %vm1145_vm1, %v1122_v26  ;;  %v1846_v31 = vadd.f32 %v1845_v29, %v1844_v27  ;;  %v1847_v33 = vpop.f32.mrb[22].mxu0  ;;  %v1960_v37 = vpop.f32.mrb[23].mxu1 }
 0x1e2   : > { %v1848_v36 = vpop.f32.mrb[23].mxu0  ;;  %v1961_v40 = vadd.f32 %v1960_v37, %v1959_v34 }
 0x1e3   : > { %v1027_v38 = vadd.f32 %v1958_v32, %v1846_v31  ;;  %v1849_v39 = vadd.f32 %v1848_v36, %v1847_v33  ;;  %v456_v31 = vld [vmem:[#allocation2 + $0x88] sm:$0xff] }
 0x1e5   : > { %v1123_v42 = vadd.f32 %v1027_v38, %v449_v35  ;;  %v1030_v43 = vadd.f32 %v1961_v40, %v1849_v39 }
 0x1e6   : > { %v1962_v46 = vpop.f32.mrb[24].mxu1 }
 0x1e7   : > { %1156 = vst.msk [vmem:[#allocation2 + $0x50] sm:$0xff] %vm1145_vm1, %v1123_v42  ;;  %v1124_v44 = vadd.f32 %v1030_v43, %v450_v41  ;;  %v1850_v45 = vpop.f32.mrb[24].mxu0  ;;  %v1963_v48 = vpop.f32.mrb[25].mxu1  ;;  %v457_v43 = vld [vmem:[#allocation2 + $0x90] sm:$0xff] }
 0x1e8   : > { %v1851_v47 = vpop.f32.mrb[25].mxu0  ;;  %v1964_v50 = vadd.f32 %v1963_v48, %v1962_v46  ;;  %v1965_v52 = vpop.f32.mrb[26].mxu1 }
 0x1e9   : > { %1157 = vst.msk [vmem:[#allocation2 + $0x58] sm:$0xff] %vm1145_vm1, %v1124_v44  ;;  %v1852_v49 = vadd.f32 %v1851_v47, %v1850_v45  ;;  %v1853_v51 = vpop.f32.mrb[26].mxu0  ;;  %v1966_v55 = vpop.f32.mrb[27].mxu1 }
 0x1ea   : > { %v1854_v54 = vpop.f32.mrb[27].mxu0  ;;  %v1967_v58 = vadd.f32 %v1966_v55, %v1965_v52 }
 0x1eb   : > { %v1035_v56 = vadd.f32 %v1964_v50, %v1852_v49  ;;  %v1855_v57 = vadd.f32 %v1854_v54, %v1853_v51  ;;  %v458_v49 = vld [vmem:[#allocation2 + $0x98] sm:$0xff] }
 0x1ed   : > { %v1125_v60 = vadd.f32 %v1035_v56, %v451_v53  ;;  %v1038_v61 = vadd.f32 %v1967_v58, %v1855_v57 }
 0x1ee   : > { %v1968_v0 = vpop.f32.mrb[28].mxu1 }
 0x1ef   : > { %1158 = vst.msk [vmem:[#allocation2 + $0x60] sm:$0xff] %vm1145_vm1, %v1125_v60  ;;  %v1126_v62 = vadd.f32 %v1038_v61, %v452_v59  ;;  %v1856_v63 = vpop.f32.mrb[28].mxu0  ;;  %v1969_v2 = vpop.f32.mrb[29].mxu1  ;;  %v459_v61 = vld [vmem:[#allocation2 + $0xa0] sm:$0xff] }
 0x1f0   : > { %v1857_v1 = vpop.f32.mrb[29].mxu0  ;;  %v1970_v4 = vadd.f32 %v1969_v2, %v1968_v0  ;;  %v1971_v6 = vpop.f32.mrb[30].mxu1 }
 0x1f1   : > { %1159 = vst.msk [vmem:[#allocation2 + $0x68] sm:$0xff] %vm1145_vm1, %v1126_v62  ;;  %v1858_v3 = vadd.f32 %v1857_v1, %v1856_v63  ;;  %v1859_v5 = vpop.f32.mrb[30].mxu0  ;;  %v1972_v9 = vpop.f32.mrb[31].mxu1 }
 0x1f2   : > { %v1860_v8 = vpop.f32.mrb[31].mxu0  ;;  %v1973_v12 = vadd.f32 %v1972_v9, %v1971_v6 }
 0x1f3   : > { %v1043_v10 = vadd.f32 %v1970_v4, %v1858_v3  ;;  %v1861_v11 = vadd.f32 %v1860_v8, %v1859_v5  ;;  %v460_v3 = vld [vmem:[#allocation2 + $0xa8] sm:$0xff] }
 0x1f5   : > { %v1127_v14 = vadd.f32 %v1043_v10, %v453_v7  ;;  %v1046_v15 = vadd.f32 %v1973_v12, %v1861_v11 }
 0x1f6   : > { %v1974_v18 = vpop.f32.mrb[32].mxu1 }
 0x1f7   : > { %1160 = vst.msk [vmem:[#allocation2 + $0x70] sm:$0xff] %vm1145_vm1, %v1127_v14  ;;  %v1128_v16 = vadd.f32 %v1046_v15, %v454_v13  ;;  %v1862_v17 = vpop.f32.mrb[32].mxu0  ;;  %v1975_v20 = vpop.f32.mrb[33].mxu1  ;;  %v461_v15 = vld [vmem:[#allocation2 + $0xb0] sm:$0xff] }
 0x1f8   : > { %v1863_v19 = vpop.f32.mrb[33].mxu0  ;;  %v1976_v22 = vadd.f32 %v1975_v20, %v1974_v18  ;;  %v1977_v24 = vpop.f32.mrb[34].mxu1 }
 0x1f9   : > { %1161 = vst.msk [vmem:[#allocation2 + $0x78] sm:$0xff] %vm1145_vm1, %v1128_v16  ;;  %v1864_v21 = vadd.f32 %v1863_v19, %v1862_v17  ;;  %v1865_v23 = vpop.f32.mrb[34].mxu0  ;;  %v1978_v27 = vpop.f32.mrb[35].mxu1 }
 0x1fa   : > { %v1866_v26 = vpop.f32.mrb[35].mxu0  ;;  %v1979_v30 = vadd.f32 %v1978_v27, %v1977_v24 }
 0x1fb   : > { %v1051_v28 = vadd.f32 %v1976_v22, %v1864_v21  ;;  %v1867_v29 = vadd.f32 %v1866_v26, %v1865_v23  ;;  %v462_v21 = vld [vmem:[#allocation2 + $0xb8] sm:$0xff] }
 0x1fd   : > { %v1129_v32 = vadd.f32 %v1051_v28, %v455_v25  ;;  %v1054_v33 = vadd.f32 %v1979_v30, %v1867_v29 }
 0x1fe   : > { %v1980_v36 = vpop.f32.mrb[36].mxu1 }
 0x1ff   : > { %1162 = vst.msk [vmem:[#allocation2 + $0x80] sm:$0xff] %vm1145_vm1, %v1129_v32  ;;  %v1130_v34 = vadd.f32 %v1054_v33, %v456_v31  ;;  %v1868_v35 = vpop.f32.mrb[36].mxu0  ;;  %v1981_v38 = vpop.f32.mrb[37].mxu1  ;;  %v463_v33 = vld [vmem:[#allocation2 + $0xc0] sm:$0xff] }
 0x200   : > { %v1869_v37 = vpop.f32.mrb[37].mxu0  ;;  %v1982_v40 = vadd.f32 %v1981_v38, %v1980_v36  ;;  %v1983_v42 = vpop.f32.mrb[38].mxu1 }
 0x201   : > { %1163 = vst.msk [vmem:[#allocation2 + $0x88] sm:$0xff] %vm1145_vm1, %v1130_v34  ;;  %v1870_v39 = vadd.f32 %v1869_v37, %v1868_v35  ;;  %v1871_v41 = vpop.f32.mrb[38].mxu0  ;;  %v1984_v45 = vpop.f32.mrb[39].mxu1 }
 0x202   : > { %v1872_v44 = vpop.f32.mrb[39].mxu0  ;;  %v1985_v48 = vadd.f32 %v1984_v45, %v1983_v42 }
 0x203   : > { %v1059_v46 = vadd.f32 %v1982_v40, %v1870_v39  ;;  %v1873_v47 = vadd.f32 %v1872_v44, %v1871_v41  ;;  %v464_v39 = vld [vmem:[#allocation2 + $0xc8] sm:$0xff] }
 0x205   : > { %v1131_v50 = vadd.f32 %v1059_v46, %v457_v43  ;;  %v1062_v51 = vadd.f32 %v1985_v48, %v1873_v47 }
 0x206   : > { %v1986_v54 = vpop.f32.mrb[40].mxu1 }
 0x207   : > { %1164 = vst.msk [vmem:[#allocation2 + $0x90] sm:$0xff] %vm1145_vm1, %v1131_v50  ;;  %v1132_v52 = vadd.f32 %v1062_v51, %v458_v49  ;;  %v1874_v53 = vpop.f32.mrb[40].mxu0  ;;  %v1987_v56 = vpop.f32.mrb[41].mxu1  ;;  %v465_v51 = vld [vmem:[#allocation2 + $0xd0] sm:$0xff] }
 0x208   : > { %v1875_v55 = vpop.f32.mrb[41].mxu0  ;;  %v1988_v58 = vadd.f32 %v1987_v56, %v1986_v54  ;;  %v1989_v60 = vpop.f32.mrb[42].mxu1 }
 0x209   : > { %1165 = vst.msk [vmem:[#allocation2 + $0x98] sm:$0xff] %vm1145_vm1, %v1132_v52  ;;  %v1876_v57 = vadd.f32 %v1875_v55, %v1874_v53  ;;  %v1877_v59 = vpop.f32.mrb[42].mxu0  ;;  %v1990_v63 = vpop.f32.mrb[43].mxu1 }
 0x20a   : > { %v1878_v62 = vpop.f32.mrb[43].mxu0  ;;  %v1991_v2 = vadd.f32 %v1990_v63, %v1989_v60 }
 0x20b   : > { %v1067_v0 = vadd.f32 %v1988_v58, %v1876_v57  ;;  %v1879_v1 = vadd.f32 %v1878_v62, %v1877_v59  ;;  %v466_v57 = vld [vmem:[#allocation2 + $0xd8] sm:$0xff] }
 0x20d   : > { %v1133_v4 = vadd.f32 %v1067_v0, %v459_v61  ;;  %v1070_v5 = vadd.f32 %v1991_v2, %v1879_v1 }
 0x20e   : > { %v1992_v8 = vpop.f32.mrb[44].mxu1 }
 0x20f   : > { %1166 = vst.msk [vmem:[#allocation2 + $0xa0] sm:$0xff] %vm1145_vm1, %v1133_v4  ;;  %v1134_v6 = vadd.f32 %v1070_v5, %v460_v3  ;;  %v1880_v7 = vpop.f32.mrb[44].mxu0  ;;  %v1993_v10 = vpop.f32.mrb[45].mxu1  ;;  %v467_v5 = vld [vmem:[#allocation2 + $0xe0] sm:$0xff] }
 0x210   : > { %v1881_v9 = vpop.f32.mrb[45].mxu0  ;;  %v1994_v12 = vadd.f32 %v1993_v10, %v1992_v8  ;;  %v1995_v14 = vpop.f32.mrb[46].mxu1 }
 0x211   : > { %1167 = vst.msk [vmem:[#allocation2 + $0xa8] sm:$0xff] %vm1145_vm1, %v1134_v6  ;;  %v1882_v11 = vadd.f32 %v1881_v9, %v1880_v7  ;;  %v1883_v13 = vpop.f32.mrb[46].mxu0  ;;  %v1996_v17 = vpop.f32.mrb[47].mxu1 }
 0x212   : > { %v1884_v16 = vpop.f32.mrb[47].mxu0  ;;  %v1997_v20 = vadd.f32 %v1996_v17, %v1995_v14 }
 0x213   : > { %v1075_v18 = vadd.f32 %v1994_v12, %v1882_v11  ;;  %v1885_v19 = vadd.f32 %v1884_v16, %v1883_v13  ;;  %v468_v11 = vld [vmem:[#allocation2 + $0xe8] sm:$0xff] }
 0x215   : > { %v1135_v22 = vadd.f32 %v1075_v18, %v461_v15  ;;  %v1078_v23 = vadd.f32 %v1997_v20, %v1885_v19 }
 0x216   : > { %v1998_v26 = vpop.f32.mrb[48].mxu1 }
 0x217   : > { %1168 = vst.msk [vmem:[#allocation2 + $0xb0] sm:$0xff] %vm1145_vm1, %v1135_v22  ;;  %v1136_v24 = vadd.f32 %v1078_v23, %v462_v21  ;;  %v1886_v25 = vpop.f32.mrb[48].mxu0  ;;  %v1999_v28 = vpop.f32.mrb[49].mxu1  ;;  %v469_v23 = vld [vmem:[#allocation2 + $0xf0] sm:$0xff] }
 0x218   : > { %v1887_v27 = vpop.f32.mrb[49].mxu0  ;;  %v2000_v30 = vadd.f32 %v1999_v28, %v1998_v26  ;;  %v2001_v32 = vpop.f32.mrb[50].mxu1 }
 0x219   : > { %1169 = vst.msk [vmem:[#allocation2 + $0xb8] sm:$0xff] %vm1145_vm1, %v1136_v24  ;;  %v1888_v29 = vadd.f32 %v1887_v27, %v1886_v25  ;;  %v1889_v31 = vpop.f32.mrb[50].mxu0  ;;  %v2002_v35 = vpop.f32.mrb[51].mxu1 }
 0x21a   : > { %v1890_v34 = vpop.f32.mrb[51].mxu0  ;;  %v2003_v38 = vadd.f32 %v2002_v35, %v2001_v32  ;;  %v1198_v35 = vld [vmem:[#allocation2 + $0x80] sm:$0xff] (!%p1757_p7) }
 0x21b   : > { %v1083_v36 = vadd.f32 %v2000_v30, %v1888_v29  ;;  %v1891_v37 = vadd.f32 %v1890_v34, %v1889_v31  ;;  %v470_v29 = vld [vmem:[#allocation2 + $0xf8] sm:$0xff]  ;;  %v1182_v34 = vld [vmem:[#allocation2] sm:$0xff] (!%p1757_p7) }
 0x21d   : > { %v1137_v40 = vadd.f32 %v1083_v36, %v463_v33  ;;  %v1086_v41 = vadd.f32 %v2003_v38, %v1891_v37  ;;  %v1246_v33 = vld [vmem:[%s2907_s2] sm:$0xff] (!%p1757_p7)  ;;  %v1214_v36 = vadd.f32 (!%p1757_p7), 1.0, %v1182_v34  ;;  %v1230_v37 = vadd.f32 (!%p1757_p7), 1.0, %v1198_v35  ;;  %v1183_v38 = vld [vmem:[#allocation2 + $0x8] sm:$0xff] (!%p1757_p7) }
 0x21e   : > { %v2004_v44 = vpop.f32.mrb[52].mxu1  ;;  %2055 = vmatprep.subr.mxu0 (!%p1757_p7), %v1246_v33  ;;  %2105 = vmatprep.subr.mxu1 (!%p1757_p7), %v1246_v33  ;;  %v2767_v34 = vld [vmem:[%s2908_s3] ss:$0 sm:$0xff] (!%p1757_p7) }
 0x21f   : > { %1170 = vst.msk [vmem:[#allocation2 + $0xc0] sm:$0xff] %vm1145_vm1, %v1137_v40  ;;  %v1138_v42 = vadd.f32 %v1086_v41, %v464_v39  ;;  %v1892_v43 = vpop.f32.mrb[52].mxu0  ;;  %v2005_v46 = vpop.f32.mrb[53].mxu1  ;;  %v1199_v39 = vld [vmem:[#allocation2 + $0x88] sm:$0xff] (!%p1757_p7)  ;;  %v1184_v40 = vld [vmem:[#allocation2 + $0x10] sm:$0xff] (!%p1757_p7)  ;;  %2056 = vmatpush3.msra.mxu0 (!%p1757_p7), %v1246_v33  ;;  %2106 = vmatpush3.msra.mxu1 (!%p1757_p7), %v1246_v33  ;;  %v1215_v41 = vadd.f32 (!%p1757_p7), 1.0, %v1183_v38 }
 0x220   : > { %v1893_v45 = vpop.f32.mrb[53].mxu0  ;;  %v2006_v48 = vadd.f32 %v2005_v46, %v2004_v44  ;;  %v2007_v50 = vpop.f32.mrb[54].mxu1  ;;  %v1200_v44 = vld [vmem:[#allocation2 + $0x90] sm:$0xff] (!%p1757_p7)  ;;  %v1201_v46 = vld [vmem:[#allocation2 + $0x98] sm:$0xff] (!%p1757_p7)  ;;  %2057 = vmatprep.mubr.msk.f32.mxu0 (!%p1757_p7), %vm1145_vm1, %v1214_v36  ;;  %2081 = vmatprep.mubr.msk.f32.mxu1 (!%p1757_p7), %vm1145_vm1, %v1230_v37 }
 0x221   : > { %1171 = vst.msk [vmem:[#allocation2 + $0xc8] sm:$0xff] %vm1145_vm1, %v1138_v42  ;;  %v1894_v47 = vadd.f32 %v1893_v45, %v1892_v43  ;;  %v1895_v49 = vpop.f32.mrb[54].mxu0  ;;  %v2008_v53 = vpop.f32.mrb[55].mxu1  ;;  %v1231_v42 = vadd.f32 (!%p1757_p7), 1.0, %v1199_v39  ;;  %v1216_v43 = vadd.f32 (!%p1757_p7), 1.0, %v1184_v40  ;;  %v1185_v45 = vld [vmem:[#allocation2 + $0x18] sm:$0xff] (!%p1757_p7)  ;;  %2058 = vmatmul.mubr.msk.f32.vlgmr.msra.gmra.mrb[0].mxu0 (!%p1757_p7), %vm1145_vm1, %v1215_v41 }
 0x222   : > { %v1896_v52 = vpop.f32.mrb[55].mxu0  ;;  %v2009_v56 = vadd.f32 %v2008_v53, %v2007_v50  ;;  %v1217_v50 = vadd.f32 (!%p1757_p7), 1.0, %v1185_v45 }
 0x223   : > { %v1091_v54 = vadd.f32 %v2006_v48, %v1894_v47  ;;  %v1897_v55 = vadd.f32 %v1896_v52, %v1895_v49  ;;  %v1232_v47 = vadd.f32 (!%p1757_p7), 1.0, %v1200_v44  ;;  %v1186_v48 = vld [vmem:[#allocation2 + $0x20] sm:$0xff] (!%p1757_p7)  ;;  %2082 = vmatmul.mubr.msk.f32.vlgmr.msra.gmra.mrb[0].mxu1 (!%p1757_p7), %vm1145_vm1, %v1231_v42  ;;  %2060 = vmatprep.mubr.msk.f32.mxu0 (!%p1757_p7), %vm1145_vm1, %v1216_v43 }
 0x224   : > { %v1202_v49 = vld [vmem:[#allocation2 + $0xa0] sm:$0xff] (!%p1757_p7)  ;;  %v1218_v52 = vadd.f32 (!%p1757_p7), 1.0, %v1186_v48 }
 0x225   : > { %v1139_v58 = vadd.f32 %v1091_v54, %v465_v51  ;;  %v1094_v59 = vadd.f32 %v2009_v56, %v1897_v55  ;;  %v1233_v51 = vadd.f32 (!%p1757_p7), 1.0, %v1201_v46  ;;  %2084 = vmatprep.mubr.msk.f32.mxu1 (!%p1757_p7), %vm1145_vm1, %v1232_v47  ;;  %v1234_v53 = vadd.f32 (!%p1757_p7), 1.0, %v1202_v49  ;;  %v1187_v54 = vld [vmem:[#allocation2 + $0x28] sm:$0xff] (!%p1757_p7)  ;;  %v1188_v56 = vld [vmem:[#allocation2 + $0x30] sm:$0xff] (!%p1757_p7)  ;;  %2061 = vmatmul.mubr.msk.f32.gmra.mrb[2].mxu0 (!%p1757_p7), %vm1145_vm1, %v1217_v50 }
 0x226   : > { %v2010_v62 = vpop.f32.mrb[56].mxu1  ;;  %v1203_v55 = vld [vmem:[#allocation2 + $0xa8] sm:$0xff] (!%p1757_p7)  ;;  %2063 = vmatprep.mubr.msk.f32.mxu0 (!%p1757_p7), %vm1145_vm1, %v1218_v52 }
 0x227   : > { %1172 = vst.msk [vmem:[#allocation2 + $0xd0] sm:$0xff] %vm1145_vm1, %v1139_v58  ;;  %v1140_v60 = vadd.f32 %v1094_v59, %v466_v57  ;;  %v1898_v61 = vpop.f32.mrb[56].mxu0  ;;  %v2011_v0 = vpop.f32.mrb[57].mxu1  ;;  %v1204_v57 = vld [vmem:[#allocation2 + $0xb0] sm:$0xff] (!%p1757_p7)  ;;  %2085 = vmatmul.mubr.msk.f32.gmra.mrb[2].mxu1 (!%p1757_p7), %vm1145_vm1, %v1233_v51  ;;  %v1219_v58 = vadd.f32 (!%p1757_p7), 1.0, %v1187_v54  ;;  %v1235_v59 = vadd.f32 (!%p1757_p7), 1.0, %v1203_v55 }
 0x228   : > { %v1899_v63 = vpop.f32.mrb[57].mxu0  ;;  %v2012_v2 = vadd.f32 %v2011_v0, %v2010_v62  ;;  %v2013_v4 = vpop.f32.mrb[58].mxu1  ;;  %2087 = vmatprep.mubr.msk.f32.mxu1 (!%p1757_p7), %vm1145_vm1, %v1234_v53  ;;  %v1189_v62 = vld [vmem:[#allocation2 + $0x38] sm:$0xff] (!%p1757_p7)  ;;  %v1190_v0 = vld [vmem:[#allocation2 + $0x40] sm:$0xff] (!%p1757_p7) }
 0x229   : > { %1173 = vst.msk [vmem:[#allocation2 + $0xd8] sm:$0xff] %vm1145_vm1, %v1140_v60  ;;  %v1900_v1 = vadd.f32 %v1899_v63, %v1898_v61  ;;  %v1901_v3 = vpop.f32.mrb[58].mxu0  ;;  %v2014_v7 = vpop.f32.mrb[59].mxu1  ;;  %v1220_v60 = vadd.f32 (!%p1757_p7), 1.0, %v1188_v56  ;;  %v1236_v61 = vadd.f32 (!%p1757_p7), 1.0, %v1204_v57  ;;  %v1205_v63 = vld [vmem:[#allocation2 + $0xb8] sm:$0xff] (!%p1757_p7)  ;;  %2064 = vmatmul.mubr.msk.f32.gmra.mrb[4].mxu0 (!%p1757_p7), %vm1145_vm1, %v1219_v58 }
 0x22a   : > { %v1902_v6 = vpop.f32.mrb[59].mxu0  ;;  %v2015_v10 = vadd.f32 %v2014_v7, %v2013_v4  ;;  %v1222_v4 = vadd.f32 (!%p1757_p7), 1.0, %v1190_v0  ;;  %v1207_v7 = vld [vmem:[#allocation2 + $0xc8] sm:$0xff] (!%p1757_p7) }
 0x22b   : > { %v1099_v8 = vadd.f32 %v2012_v2, %v1900_v1  ;;  %v1903_v9 = vadd.f32 %v1902_v6, %v1901_v3  ;;  %v1206_v1 = vld [vmem:[#allocation2 + $0xc0] sm:$0xff] (!%p1757_p7)  ;;  %2088 = vmatmul.mubr.msk.f32.gmra.mrb[4].mxu1 (!%p1757_p7), %vm1145_vm1, %v1235_v59  ;;  %v1221_v2 = vadd.f32 (!%p1757_p7), 1.0, %v1189_v62  ;;  %v1237_v3 = vadd.f32 (!%p1757_p7), 1.0, %v1205_v63  ;;  %2066 = vmatprep.mubr.msk.f32.mxu0 (!%p1757_p7), %vm1145_vm1, %v1220_v60  ;;  %v1191_v6 = vld [vmem:[#allocation2 + $0x48] sm:$0xff] (!%p1757_p7) }
 0x22c   : > { %2090 = vmatprep.mubr.msk.f32.mxu1 (!%p1757_p7), %vm1145_vm1, %v1236_v61 }
 0x22d   : > { %v1141_v12 = vadd.f32 %v1099_v8, %v467_v5  ;;  %v1102_v13 = vadd.f32 %v2015_v10, %v1903_v9  ;;  %v1238_v5 = vadd.f32 (!%p1757_p7), 1.0, %v1206_v1  ;;  %v1192_v8 = vld [vmem:[#allocation2 + $0x50] sm:$0xff] (!%p1757_p7)  ;;  %2067 = vmatmul.mubr.msk.f32.gmra.mrb[6].mxu0 (!%p1757_p7), %vm1145_vm1, %v1221_v2  ;;  %v1223_v10 = vadd.f32 (!%p1757_p7), 1.0, %v1191_v6 }
 0x22e   : > { %v2016_v16 = vpop.f32.mrb[60].mxu1  ;;  %v1208_v9 = vld [vmem:[#allocation2 + $0xd0] sm:$0xff] (!%p1757_p7)  ;;  %2069 = vmatprep.mubr.msk.f32.mxu0 (!%p1757_p7), %vm1145_vm1, %v1222_v4 }
 0x22f   : > { %1174 = vst.msk [vmem:[#allocation2 + $0xe0] sm:$0xff] %vm1145_vm1, %v1141_v12  ;;  %v1142_v14 = vadd.f32 %v1102_v13, %v468_v11  ;;  %v1904_v15 = vpop.f32.mrb[60].mxu0  ;;  %v2017_v18 = vpop.f32.mrb[61].mxu1  ;;  %2091 = vmatmul.mubr.msk.f32.gmra.mrb[6].mxu1 (!%p1757_p7), %vm1145_vm1, %v1237_v3  ;;  %v1239_v11 = vadd.f32 (!%p1757_p7), 1.0, %v1207_v7  ;;  %v1224_v12 = vadd.f32 (!%p1757_p7), 1.0, %v1192_v8  ;;  %v1240_v13 = vadd.f32 (!%p1757_p7), 1.0, %v1208_v9 }
 0x230   : > { %v1905_v17 = vpop.f32.mrb[61].mxu0  ;;  %v2018_v20 = vadd.f32 %v2017_v18, %v2016_v16  ;;  %v2019_v22 = vpop.f32.mrb[62].mxu1  ;;  %2093 = vmatprep.mubr.msk.f32.mxu1 (!%p1757_p7), %vm1145_vm1, %v1238_v5  ;;  %v1194_v16 = vld [vmem:[#allocation2 + $0x60] sm:$0xff] (!%p1757_p7) }
 0x231   : > { %1175 = vst.msk [vmem:[#allocation2 + $0xe8] sm:$0xff] %vm1145_vm1, %v1142_v14  ;;  %v1906_v19 = vadd.f32 %v1905_v17, %v1904_v15  ;;  %v1907_v21 = vpop.f32.mrb[62].mxu0  ;;  %v2020_v25 = vpop.f32.mrb[63].mxu1  ;;  %v1193_v14 = vld [vmem:[#allocation2 + $0x58] sm:$0xff] (!%p1757_p7)  ;;  %2070 = vmatmul.mubr.msk.f32.gmra.mrb[8].mxu0 (!%p1757_p7), %vm1145_vm1, %v1223_v10 }
 0x232   : > { %v1908_v24 = vpop.f32.mrb[63].mxu0  ;;  %v2021_v28 = vadd.f32 %v2020_v25, %v2019_v22  ;;  %v1209_v15 = vld [vmem:[#allocation2 + $0xd8] sm:$0xff] (!%p1757_p7)  ;;  %v1225_v18 = vadd.f32 (!%p1757_p7), 1.0, %v1193_v14  ;;  %2072 = vmatprep.mubr.msk.f32.mxu0 (!%p1757_p7), %vm1145_vm1, %v1224_v12  ;;  %v1195_v22 = vld [vmem:[#allocation2 + $0x68] sm:$0xff] (!%p1757_p7) }
 0x233   : > { %v1107_v26 = vadd.f32 %v2018_v20, %v1906_v19  ;;  %v1909_v27 = vadd.f32 %v1908_v24, %v1907_v21  ;;  %1181 = sbr.rel (%p1757_p7) target bundleno = 795 (0x31b), region = 48  ;;  %2094 = vmatmul.mubr.msk.f32.gmra.mrb[8].mxu1 (!%p1757_p7), %vm1145_vm1, %v1239_v11  ;;  %v1241_v19 = vadd.f32 (!%p1757_p7), 1.0, %v1209_v15  ;;  %v1226_v20 = vadd.f32 (!%p1757_p7), 1.0, %v1194_v16  ;;  %v1196_v24 = vld [vmem:[#allocation2 + $0x70] sm:$0xff] (!%p1757_p7) }
 0x234   : > { %2096 = vmatprep.mubr.msk.f32.mxu1 (!%p1757_p7), %vm1145_vm1, %v1240_v13 }
 0x235   : > { %v1143_v30 = vadd.f32 %v1107_v26, %v469_v23  ;;  %v1110_v31 = vadd.f32 %v2021_v28, %v1909_v27  ;;  %2073 = vmatmul.mubr.msk.f32.gmra.mrb[10].mxu0 (!%p1757_p7), %vm1145_vm1, %v1225_v18  ;;  %v1227_v26 = vadd.f32 (!%p1757_p7), 1.0, %v1195_v22  ;;  %v1228_v28 = vadd.f32 (!%p1757_p7), 1.0, %v1196_v24 }
 0x236   : > { %v1210_v17 = vld [vmem:[#allocation2 + $0xe0] sm:$0xff] (!%p1757_p7)  ;;  %2075 = vmatprep.mubr.msk.f32.mxu0 (!%p1757_p7), %vm1145_vm1, %v1226_v20 }
 0x237   : > { %1176 = vst.msk [vmem:[#allocation2 + $0xf0] sm:$0xff] %vm1145_vm1, %v1143_v30  ;;  %v1144_v32 = vadd.f32 %v1110_v31, %v470_v29  ;;  %v1242_v21 = vadd.f32 (!%p1757_p7), 1.0, %v1210_v17  ;;  %2097 = vmatmul.mubr.msk.f32.gmra.mrb[10].mxu1 (!%p1757_p7), %vm1145_vm1, %v1241_v19  ;;  %v1197_v30 = vld [vmem:[#allocation2 + $0x78] sm:$0xff] (!%p1757_p7) }
 0x238   : > { %v1211_v23 = vld [vmem:[#allocation2 + $0xe8] sm:$0xff] (!%p1757_p7) }
 0x239   : > { %1177 = vst.msk [vmem:[#allocation2 + $0xf8] sm:$0xff] %vm1145_vm1, %v1144_v32  ;;  %v1243_v27 = vadd.f32 (!%p1757_p7), 1.0, %v1211_v23  ;;  %2099 = vmatprep.mubr.msk.f32.mxu1 (!%p1757_p7), %vm1145_vm1, %v1242_v21  ;;  %2076 = vmatmul.mubr.msk.f32.gmra.mrb[12].mxu0 (!%p1757_p7), %vm1145_vm1, %v1227_v26  ;;  %v1229_v32 = vadd.f32 (!%p1757_p7), 1.0, %v1197_v30 }
 0x23a   : > { %2078 = vmatprep.mubr.msk.f32.mxu0 %vm1145_vm1, %v1228_v28 }
 0x23b   : > { %2100 = vmatmul.mubr.msk.f32.gmra.mrb[12].mxu1 %vm1145_vm1, %v1243_v27 }
 0x23d   : > { %2079 = vmatmul.mubr.msk.f32.gmra.mrb[14].mxu0 %vm1145_vm1, %v1229_v32 }
 0x23e   : > { %v1212_v25 = vld [vmem:[#allocation2 + $0xf0] sm:$0xff] }
 0x23f   : > { %v1244_v29 = vadd.f32 1.0, %v1212_v25 }
 0x240   : > { %v1213_v31 = vld [vmem:[#allocation2 + $0xf8] sm:$0xff] }
 0x241   : > { %v1245_v33 = vadd.f32 1.0, %v1213_v31  ;;  %2102 = vmatprep.mubr.msk.f32.mxu1 %vm1145_vm1, %v1244_v29 }
 0x243   : > { %2103 = vmatmul.mubr.msk.f32.gmra.mrb[14].mxu1 %vm1145_vm1, %v1245_v33 }
 0x2f4   : > { %v2059_v35 = vpop.f32.mrb[0].mxu0 }
 0x2f5   : > { %v1422_v37 = vadd.f32 %v2059_v35, %v2767_v34  ;;  %v1416_v39 = vpop.f32.mrb[1].mxu0 }
 0x2f6   : > { %v2083_v36 = vpop.f32.mrb[0].mxu1  ;;  %v1417_v41 = vadd.f32 %v2767_v34, %v1416_v39 }
 0x2f7   : > { %v1502_v38 = vadd.f32 %v2083_v36, %v2767_v34  ;;  %v1496_v40 = vpop.f32.mrb[1].mxu1  ;;  %1576 = vst [vmem:[%s2591_s29 + $0x8] sm:$0xff] %v1422_v37 }
 0x2f8   : > { %v1497_v42 = vadd.f32 %v2767_v34, %v1496_v40  ;;  %1575 = vst [vmem:[%s2591_s29] sm:$0xff] %v1417_v41  ;;  %v2062_v43 = vpop.f32.mrb[2].mxu0 }
 0x2f9   : > { %1592 = vst [vmem:[%s2591_s29 + $0x88] sm:$0xff] %v1502_v38  ;;  %v1432_v45 = vadd.f32 %v2062_v43, %v2767_v34  ;;  %v1426_v47 = vpop.f32.mrb[3].mxu0 }
 0x2fa   : > { %1591 = vst [vmem:[%s2591_s29 + $0x80] sm:$0xff] %v1497_v42  ;;  %v2086_v44 = vpop.f32.mrb[2].mxu1  ;;  %v1427_v49 = vadd.f32 %v2767_v34, %v1426_v47 }
 0x2fb   : > { %v1512_v46 = vadd.f32 %v2086_v44, %v2767_v34  ;;  %v1506_v48 = vpop.f32.mrb[3].mxu1  ;;  %1578 = vst [vmem:[%s2591_s29 + $0x18] sm:$0xff] %v1432_v45 }
 0x2fc   : > { %v1507_v50 = vadd.f32 %v2767_v34, %v1506_v48  ;;  %1577 = vst [vmem:[%s2591_s29 + $0x10] sm:$0xff] %v1427_v49  ;;  %v2065_v51 = vpop.f32.mrb[4].mxu0 }
 0x2fd   : > { %1594 = vst [vmem:[%s2591_s29 + $0x98] sm:$0xff] %v1512_v46  ;;  %v1442_v53 = vadd.f32 %v2065_v51, %v2767_v34  ;;  %v1436_v55 = vpop.f32.mrb[5].mxu0 }
 0x2fe   : > { %1593 = vst [vmem:[%s2591_s29 + $0x90] sm:$0xff] %v1507_v50  ;;  %v2089_v52 = vpop.f32.mrb[4].mxu1  ;;  %v1437_v57 = vadd.f32 %v2767_v34, %v1436_v55 }
 0x2ff   : > { %v1522_v54 = vadd.f32 %v2089_v52, %v2767_v34  ;;  %v1516_v56 = vpop.f32.mrb[5].mxu1  ;;  %1580 = vst [vmem:[%s2591_s29 + $0x28] sm:$0xff] %v1442_v53 }
 0x300   : > { %v1517_v58 = vadd.f32 %v2767_v34, %v1516_v56  ;;  %1579 = vst [vmem:[%s2591_s29 + $0x20] sm:$0xff] %v1437_v57  ;;  %v2068_v59 = vpop.f32.mrb[6].mxu0 }
 0x301   : > { %1596 = vst [vmem:[%s2591_s29 + $0xa8] sm:$0xff] %v1522_v54  ;;  %v1452_v61 = vadd.f32 %v2068_v59, %v2767_v34  ;;  %v1446_v63 = vpop.f32.mrb[7].mxu0 }
 0x302   : > { %1595 = vst [vmem:[%s2591_s29 + $0xa0] sm:$0xff] %v1517_v58  ;;  %v2092_v60 = vpop.f32.mrb[6].mxu1  ;;  %v1447_v1 = vadd.f32 %v2767_v34, %v1446_v63 }
 0x303   : > { %v1532_v62 = vadd.f32 %v2092_v60, %v2767_v34  ;;  %v1526_v0 = vpop.f32.mrb[7].mxu1  ;;  %1582 = vst [vmem:[%s2591_s29 + $0x38] sm:$0xff] %v1452_v61 }
 0x304   : > { %v1527_v2 = vadd.f32 %v2767_v34, %v1526_v0  ;;  %1581 = vst [vmem:[%s2591_s29 + $0x30] sm:$0xff] %v1447_v1  ;;  %v2071_v3 = vpop.f32.mrb[8].mxu0 }
 0x305   : > { %1598 = vst [vmem:[%s2591_s29 + $0xb8] sm:$0xff] %v1532_v62  ;;  %v1462_v5 = vadd.f32 %v2071_v3, %v2767_v34  ;;  %v1456_v7 = vpop.f32.mrb[9].mxu0 }
 0x306   : > { %1597 = vst [vmem:[%s2591_s29 + $0xb0] sm:$0xff] %v1527_v2  ;;  %v2095_v4 = vpop.f32.mrb[8].mxu1  ;;  %v1457_v9 = vadd.f32 %v2767_v34, %v1456_v7 }
 0x307   : > { %v1542_v6 = vadd.f32 %v2095_v4, %v2767_v34  ;;  %v1536_v8 = vpop.f32.mrb[9].mxu1  ;;  %1584 = vst [vmem:[%s2591_s29 + $0x48] sm:$0xff] %v1462_v5 }
 0x308   : > { %v1537_v10 = vadd.f32 %v2767_v34, %v1536_v8  ;;  %1583 = vst [vmem:[%s2591_s29 + $0x40] sm:$0xff] %v1457_v9  ;;  %v2074_v11 = vpop.f32.mrb[10].mxu0 }
 0x309   : > { %1600 = vst [vmem:[%s2591_s29 + $0xc8] sm:$0xff] %v1542_v6  ;;  %v1472_v13 = vadd.f32 %v2074_v11, %v2767_v34  ;;  %v1466_v15 = vpop.f32.mrb[11].mxu0 }
 0x30a   : > { %1599 = vst [vmem:[%s2591_s29 + $0xc0] sm:$0xff] %v1537_v10  ;;  %v2098_v12 = vpop.f32.mrb[10].mxu1  ;;  %v1467_v17 = vadd.f32 %v2767_v34, %v1466_v15 }
 0x30b   : > { %v1552_v14 = vadd.f32 %v2098_v12, %v2767_v34  ;;  %v1546_v16 = vpop.f32.mrb[11].mxu1  ;;  %1586 = vst [vmem:[%s2591_s29 + $0x58] sm:$0xff] %v1472_v13 }
 0x30c   : > { %v1547_v18 = vadd.f32 %v2767_v34, %v1546_v16  ;;  %1585 = vst [vmem:[%s2591_s29 + $0x50] sm:$0xff] %v1467_v17  ;;  %v2077_v19 = vpop.f32.mrb[12].mxu0 }
 0x30d   : > { %1602 = vst [vmem:[%s2591_s29 + $0xd8] sm:$0xff] %v1552_v14  ;;  %v1482_v21 = vadd.f32 %v2077_v19, %v2767_v34  ;;  %v1476_v23 = vpop.f32.mrb[13].mxu0 }
 0x30e   : > { %1601 = vst [vmem:[%s2591_s29 + $0xd0] sm:$0xff] %v1547_v18  ;;  %v2101_v20 = vpop.f32.mrb[12].mxu1  ;;  %v1477_v25 = vadd.f32 %v2767_v34, %v1476_v23 }
 0x30f   : > { %v1562_v22 = vadd.f32 %v2101_v20, %v2767_v34  ;;  %v1556_v24 = vpop.f32.mrb[13].mxu1  ;;  %1588 = vst [vmem:[%s2591_s29 + $0x68] sm:$0xff] %v1482_v21 }
 0x310   : > { %v1557_v26 = vadd.f32 %v2767_v34, %v1556_v24  ;;  %1587 = vst [vmem:[%s2591_s29 + $0x60] sm:$0xff] %v1477_v25  ;;  %v2080_v27 = vpop.f32.mrb[14].mxu0 }
 0x311   : > { %1604 = vst [vmem:[%s2591_s29 + $0xe8] sm:$0xff] %v1562_v22  ;;  %v1492_v29 = vadd.f32 %v2080_v27, %v2767_v34  ;;  %v1486_v31 = vpop.f32.mrb[15].mxu0 }
 0x312   : > { %1603 = vst [vmem:[%s2591_s29 + $0xe0] sm:$0xff] %v1557_v26  ;;  %v1487_v33 = vadd.f32 %v2767_v34, %v1486_v31 }
 0x313   : > { %1590 = vst [vmem:[%s2591_s29 + $0x78] sm:$0xff] %v1492_v29 }
 0x314   : > { %1589 = vst [vmem:[%s2591_s29 + $0x70] sm:$0xff] %v1487_v33 }
 0x316   : > { %v2104_v28 = vpop.f32.mrb[14].mxu1 }
 0x317   : > { %v1572_v30 = vadd.f32 %v2104_v28, %v2767_v34  ;;  %v1566_v32 = vpop.f32.mrb[15].mxu1 }
 0x318   : > { %v1567_v35 = vadd.f32 %v2767_v34, %v1566_v32 }
 0x319   : > { %1606 = vst [vmem:[%s2591_s29 + $0xf8] sm:$0xff] %v1572_v30 }
 0x31a   : > { %1605 = vst [vmem:[%s2591_s29 + $0xf0] sm:$0xff] %v1567_v35 }
 0x31b PF: > { %s1797_s18 = sshll.u32 %s2387_s22, 12  ;;  %s1621_s26 = sshll.u32 %s2591_s29, 4  ;;  %s2840_s26 = int_to_ptr.vmem [resolvable:$true] %s1621_s26 }
 0x31c   : > { %s2837_s8 = scalar_lea.hbm %s2909_s4, %s1797_s18  ;;  %s2844_s27 = scalar_lea.sflag [#allocation5], %s230_s30 }
 0x31d   : > { %s2277_s6 = scalar_lea.vmem %s2840_s26, 4096  ;;  %p2924_p4 = scmp.ne.s32.totalorder %s2919_s11, 0 }
 0x31e   : > { %p2278_p2 = scmp.ne.s32.totalorder %s2840_s26, %s2277_s6  ;;  %s2406_s22 = smov [#allocation6]  }
 0x31f   : > { %s2281_s28 = sshll.u32 %s2406_s22, 4  ;;  %s2282_s28 = int_to_ptr.vmem [resolvable:$false] %s2281_s28 }
 0x320   : > { %p2279_p0 = pnand %p2278_p2, %p2924_p4  ;;  %s2283_s13 = scalar_lea.vmem %s2282_s28, 8192 }
 0x321   : > { %p2284_p6 = scmp.lt.s32.totalorder %s2840_s26, %s2282_s28  ;;  %p2285_p8 = scmp.lt.s32.totalorder %s2283_s13, %s2277_s6 }
 0x322   : > { %p2280_p1 = pneg %p2279_p0 }
 0x323   : > { %p2286_p10 = por %p2285_p8, %p2284_p6 }
 0x325   : > { %p2287_p11 = pnand %p2286_p10, %p2280_p1 }
 0x327   : > { %2290 = shalt.err (!%p2287_p11)
}
 0x328   : > { %s2291_s30 = scalar_lea.hbm %s2837_s8, 4096  ;;  %s2295_s9 = scalar_lea.hbm %s2909_s4, 16384 }
 0x329   : > { %p2292_p13 = scmp.ne.s32.totalorder %s2837_s8, %s2291_s30  ;;  %p2296_p9 = scmp.lt.u32.totalorder %s2837_s8, %s2909_s4 }
 0x32a   : > { %p2297_p12 = scmp.lt.u32.totalorder %s2295_s9, %s2291_s30  ;;  %p2299_p2 = scmp.lt.u32.totalorder %s2291_s30, %s2837_s8 }
 0x32b   : > { %p2293_p5 = pnand %p2292_p13, %p2924_p4 }
 0x32c   : > { %p2298_p7 = por %p2297_p12, %p2296_p9 }
 0x32d   : > { %p2294_p3 = pneg %p2293_p5 }
 0x32e   : > { %p2300_p0 = por %p2299_p2, %p2298_p7 }
 0x330   : > { %p2301_p1 = pnand %p2300_p0, %p2294_p3 }
 0x332   : > { %2304 = shalt.err (!%p2301_p1)
}
 0x333   : > { %s2407_s18 = smov 128   ;;  %s2408_s7 = smov 8  }
 0x334   : > { %2109 = dma.vmem_to_hbm [thread:$0]  (%p2924_p4), %s2840_s26, 4096, %s2837_s8, %s2844_s27, %s2407_s18, %s2407_s18, %s2408_s7  }
 0x335 PF: > { %p2120_p6 = scmp.ge.s32.totalorder %s2399_s25, 2  ;;  %s1636_s20 = sand.u32 1, %s2359_s15  }
 0x336   : > { %p2925_p8 = scmp.ne.s32.totalorder %s2921_s14, 0  ;;  %s1637_s6 = scalar_lea.sflag [#allocation5], %s1636_s20 }
 0x338   : > { %p2116_p10 = pnand %p2120_p6, %p2925_p8 }
 0x33a   : > { %2354 = dma.done.wait (!%p2116_p10), %s1637_s6, 4096  }
 0x33b   : > { %2356 = vsyncadd (!%p2116_p10), %s1637_s6, 4294963200  ;;  %s20_s25 = sadd.s32 1, %s2399_s25   ;;  %s2926_s11 = sld [smem:[#allocation9_spill]] }
 0x33c   : > { %p17_p11 = scmp.ge.s32.totalorder %s20_s25, 10   ;;  %s2927_s20 = sld [smem:[#allocation12_spill]] }
 0x33d   : > { %s2928_s8 = sld [smem:[#allocation10_spill]]  ;;  %s2929_s26 = sld [smem:[#allocation11_spill]] }
 0x33e   : > { %s2930_s15 = smov %s2363_s16  ;;  %s2931_s16 = smov %s2367_s17 }
 0x33f   : > { %s2932_s17 = smov %s2521_s12  ;;  %s2933_s18 = smov %s2375_s19 }
 0x340   : > { %s2935_s21 = smov %s2391_s23  ;;  %s2936_s22 = smov %s2395_s24 }
 0x341   : > { %s2934_s19 = smov %s2926_s11  ;;  %19 = sbr.rel (!%p17_p11) target bundleno = 9 (0x9), region = 90 }
 0x343   : > { %s2937_s23 = smov %s2928_s8  ;;  %s2938_s24 = smov %s2929_s26 }
 0x348   :  { %1642 = vsyncpa [#allocation4], 1 }
 0x349   :  { %1644 = vsyncpa [#allocation4 + $0x1], 1 }
 0x34a   :  { %1645 = vsyncpa [#allocation5], 1 }
 0x34b   :  { %1647 = vsyncpa [#allocation5 + $0x1], 1 }

</bundles_post_ra>
